<compile_context>
chip_gen: v5e
topology: v5e:2x2
jax: 0.10.0
libtpu: 0.0.40
codegen_flags: <defaults>
</compile_context>

<pallas_src>
import math
import jax
import jax.numpy as jnp
from jax.experimental import pallas as pl
from jax.experimental.pallas import tpu as pltpu

# ---------------- configuration (small demo sizes) ----------------
B = 2               # batch
T = 8               # frames per batch element
C_IN = 2            # decoder input features (f0_scaled, loudness_scaled)
HID = 32            # decoder hidden size
K = 6               # FM operators (3 carrier/modulator pairs)
PC = 4              # padded bank size (3 real carriers/modulators + 1 pad)
KP = 2 * PC         # padded operator rows (sublane friendly: 8)
BLOCK_SIZE = 16     # samples per frame
N = T * BLOCK_SIZE  # audio samples per batch element (= 128)
BT = B * T          # decoder frames, all batches (= 16 lanes)
BN = B * N          # audio samples, all batches  (= 256 lanes)
SAMPLE_RATE = 16000.0
TWO_PI = 2.0 * math.pi
LOG10 = math.log(10.0)
F0_SCALE = 2000.0
FBLOCK = float(BLOCK_SIZE)

CARRIER_OPS = (0, 2, 4)    # even ops are carriers (summed into the output)
MODULATOR_OPS = (1, 3, 5)  # op k+1 modulates op k

# ---- single parameter-slab layout (one DMA; all row offsets 8-aligned) ----
W1_ROW = 0                 # rows [0:32)  cols [0:C_IN) = w1^T, col C_IN = b1
W2_ROW = HID               # rows [32:40) cols [0:HID)  = packed w2^T,
                           #              col HID = packed b2, col HID+1 = freq ratios
UP_ROW = W2_ROW + KP       # rows [40:56) U_phase [BT, BN]
UE_ROW = UP_ROW + BT       # rows [56:72) U_env   [BT, BN]
SLAB_ROWS = UE_ROW + BT    # 72
SLAB_COLS = BN             # 256

HIGHEST = jax.lax.Precision.HIGHEST


# -------- fused decoder + FM synth kernel (whole batch, one grid step) --------
def ddsp_fused_kernel(xp_ref, slab_ref, out_ref):
    # ---- decoder MLP: Linear -> ReLU -> Linear -> modified sigmoid ----
    xp = xp_ref[...]                                     # [C_IN, BT]
    f0s = xp[0:1, :]                                     # [1, BT] scaled f0
    loud = xp[1:2, :]                                    # [1, BT] scaled loudness
    w1t = slab_ref[W1_ROW:W1_ROW + HID, 0:C_IN]          # [HID, C_IN]
    b1c = slab_ref[W1_ROW:W1_ROW + HID, C_IN:C_IN + 1]   # [HID, 1]
    # first layer: contraction depth is only 2 -> two VPU broadcast-FMAs, no MXU
    h = jnp.maximum(w1t[:, 0:1] * f0s + w1t[:, 1:2] * loud + b1c, 0.0)   # [HID, BT]

    w2pt = slab_ref[W2_ROW:W2_ROW + KP, 0:HID]            # [KP, HID] packed, transposed
    b2c = slab_ref[W2_ROW:W2_ROW + KP, HID:HID + 1]       # [KP, 1]
    fr = slab_ref[W2_ROW:W2_ROW + KP, HID + 1:HID + 2]    # [KP, 1] angular freq ratios
    y = jnp.dot(w2pt, h, preferred_element_type=jnp.float32,
                precision=HIGHEST) + b2c                  # [KP, BT]
    # modified sigmoid: 2*sigmoid(y)**log(10) + 1e-7 == 2*exp(-log10*softplus(-y)) + 1e-7
    # stable softplus(-y) = max(-y, 0) + log(1 + exp(-|y|)) -> no inf intermediate
    sp = jnp.maximum(-y, 0.0) + jnp.log(1.0 + jnp.exp(-jnp.abs(y)))
    ol = 2.0 * jnp.exp(-LOG10 * sp) + 1e-7                 # [KP, BT]

    # ---- frame -> sample upsample + phase cumsum: two small MXU matmuls ----
    u_phase = slab_ref[UP_ROW:UP_ROW + BT, :]              # [BT, BN] cumsum ramp (const)
    u_env = slab_ref[UE_ROW:UE_ROW + BT, :]                # [BT, BN] one-hot upsample (const)
    ol_up = jnp.dot(ol, u_env, preferred_element_type=jnp.float32,
                    precision=HIGHEST)                     # [KP, BN]
    # per-operator angular freq per frame (ratio * 2*pi/sr folded into fr,
    # f0 un-scaling folded into u_phase), then phase accumulation on the MXU
    f_kc = fr * f0s                                        # [KP, BT]
    ph = jnp.dot(f_kc, u_phase, preferred_element_type=jnp.float32,
                 precision=HIGHEST)                        # [KP, BN]
    # TODO(synk): re-introduce 2*pi phase wrapping for long audio; at N=128 the
    # max phase (~300 rad) is well inside f32 sin argument-reduction accuracy.

    # ---- FM patch: rows 0..PC-1 = carriers, rows PC..KP-1 = paired modulators ----
    mod_sig = ol_up[PC:KP, :] * jnp.sin(ph[PC:KP, :])                     # [PC, BN]
    carrier = ol_up[0:PC, :] * jnp.sin(ph[0:PC, :] + TWO_PI * mod_sig)    # [PC, BN]
    # padded pair (rows 3 / 7) has zero frequency ratio -> contributes exactly 0
    out_ref[...] = jnp.sum(carrier, axis=0, keepdims=True)                # [1, BN]


def run_ddsp_fused(xp, slab):
    return pl.pallas_call(
        ddsp_fused_kernel,
        out_shape=jax.ShapeDtypeStruct((1, BN), jnp.float32),
        grid=(1,),
        in_specs=[
            pl.BlockSpec((C_IN, BT), lambda i: (0, 0)),            # packed features
            pl.BlockSpec((SLAB_ROWS, SLAB_COLS), lambda i: (0, 0)),  # one param slab
        ],
        out_specs=pl.BlockSpec((1, BN), lambda i: (0, 0)),
        compiler_params=pltpu.CompilerParams(
            dimension_semantics=("arbitrary",)),
    )(xp, slab)


# ---------------- DDSP_Decoder forward (decoder -> synth, fused) ----------------
def ddsp_decoder_forward(xp, slab):
    """xp: [C_IN, B*T] packed (f0_scaled, loudness); returns audio [B, N, 1]."""
    audio = run_ddsp_fused(xp, slab)          # [1, B*N], lane-dense store
    return audio.reshape(B, N, 1)             # pure (bitcast) reshape


# ---------------- parameters: packed slab (kernel) + raw (reference) ------------
def make_params():
    key = jax.random.PRNGKey(0)
    k1, k2, k3, k4 = jax.random.split(key, 4)
    w1 = 0.2 * jax.random.normal(k1, (C_IN, HID), jnp.float32)
    b1 = 0.05 * jax.random.normal(k2, (HID,), jnp.float32)
    w2 = 0.2 * jax.random.normal(k3, (HID, K), jnp.float32)
    b2 = 0.05 * jax.random.normal(k4, (K,), jnp.float32)
    # fixed FM patch: operator frequency ratios for ops 0..5
    ratios = jnp.array([1.0, 2.0, 1.0, 3.0, 1.0, 14.0], jnp.float32)

    car = jnp.array(CARRIER_OPS)
    mod = jnp.array(MODULATOR_OPS)

    # NOTE: padded operator rows (3 and 7) MUST keep zero frequency ratios in
    # BOTH banks so their (nonzero) envelopes contribute exactly 0 audio.
    w2pt = jnp.zeros((KP, HID), jnp.float32)
    w2pt = w2pt.at[0:3].set(w2.T[car]).at[PC:PC + 3].set(w2.T[mod])
    b2p = jnp.zeros((KP,), jnp.float32)
    b2p = b2p.at[0:3].set(b2[car]).at[PC:PC + 3].set(b2[mod])
    frp = jnp.zeros((KP,), jnp.float32)        # angular ratios, 2*pi/sr folded in
    frp = frp.at[0:3].set(ratios[car] * (TWO_PI / SAMPLE_RATE))
    frp = frp.at[PC:PC + 3].set(ratios[mod] * (TWO_PI / SAMPLE_RATE))

    # constant frame->sample matrices, batch-blocked (sample column s = b*N + n)
    s_idx = jnp.arange(BN)
    sb, sn = s_idx // N, s_idx % N
    st, sj = sn // BLOCK_SIZE, sn % BLOCK_SIZE
    c_idx = jnp.arange(BT)
    cb, ct = c_idx // T, c_idx % T
    same_b = cb[:, None] == sb[None, :]
    cur = (same_b & (ct[:, None] == st[None, :])).astype(jnp.float32)
    past = (same_b & (ct[:, None] < st[None, :])).astype(jnp.float32)
    u_env = cur                                                   # one-hot upsample
    # inclusive-cumsum ramp; F0_SCALE (f0 un-scaling) folded in host-side
    u_phase = F0_SCALE * (FBLOCK * past
                          + (sj[None, :].astype(jnp.float32) + 1.0) * cur)

    slab = jnp.zeros((SLAB_ROWS, SLAB_COLS), jnp.float32)
    slab = slab.at[W1_ROW:W1_ROW + HID, 0:C_IN].set(w1.T)
    slab = slab.at[W1_ROW:W1_ROW + HID, C_IN].set(b1)
    slab = slab.at[W2_ROW:W2_ROW + KP, 0:HID].set(w2pt)
    slab = slab.at[W2_ROW:W2_ROW + KP, HID].set(b2p)
    slab = slab.at[W2_ROW:W2_ROW + KP, HID + 1].set(frp)
    slab = slab.at[UP_ROW:UP_ROW + BT, :].set(u_phase)
    slab = slab.at[UE_ROW:UE_ROW + BT, :].set(u_env)

    raw = (w1, b1, w2, b2, ratios)
    return slab, raw


# ---------------- pure-JAX reference (original, unpacked formulation) ----------
def reference_forward(x, raw_params):
    w1, b1, w2, b2, ratios = raw_params
    f0 = x[..., 0] * F0_SCALE                                   # [B, T]
    h = jnp.maximum(jnp.einsum("btc,ch->bth", x, w1, precision="highest") + b1, 0.0)
    y = jnp.einsum("bth,hk->btk", h, w2, precision="highest") + b2     # [B, T, K]
    ol = 2.0 * jax.nn.sigmoid(y) ** LOG10 + 1e-7                # [B, T, K]
    ol_up = jnp.repeat(ol, BLOCK_SIZE, axis=1)                  # [B, N, K]
    f0_up = jnp.repeat(f0, BLOCK_SIZE, axis=1)                  # [B, N]
    phase = (TWO_PI / SAMPLE_RATE) * jnp.cumsum(f0_up, axis=1)  # [B, N]
    op_phase = phase[..., None] * ratios[None, None, :]         # [B, N, K]
    mod_sig = ol_up * jnp.sin(op_phase)
    routed = jnp.zeros_like(mod_sig)
    routed = routed.at[..., 0].set(mod_sig[..., 1])
    routed = routed.at[..., 2].set(mod_sig[..., 3])
    routed = routed.at[..., 4].set(mod_sig[..., 5])
    carrier = ol_up * jnp.sin(op_phase + TWO_PI * routed)
    audio = carrier[..., 0] + carrier[..., 2] + carrier[..., 4]
    return audio[..., None]                                     # [B, N, 1]


if __name__ == "__main__":
    slab, raw = make_params()
    key = jax.random.PRNGKey(0)
    kf, kl = jax.random.split(key)
    f0_scaled = jax.random.uniform(kf, (B, T), jnp.float32,
                                   minval=0.05, maxval=0.2)     # ~100..400 Hz
    loudness = jax.random.uniform(kl, (B, T), jnp.float32)

    # kernel-layout input (packed once, column c = b*T + t; no per-call transpose)
    xp = jnp.stack([f0_scaled.reshape(-1), loudness.reshape(-1)], axis=0)  # [C_IN, B*T]
    # reference-layout input
    x = jnp.stack([f0_scaled, loudness], axis=-1)                          # [B, T, C_IN]

    audio = jax.jit(ddsp_decoder_forward)(xp, slab)
    jax.block_until_ready(audio)
    assert audio.shape == (B, N, 1) and audio.dtype == jnp.float32
    assert bool(jnp.all(jnp.isfinite(audio)))

    ref = reference_forward(x, raw)
    max_err = float(jnp.max(jnp.abs(audio - ref)))
    assert max_err < 2e-3, f"kernel/reference mismatch: max abs err = {max_err}"
    print("KERNEL_OK")
</pallas_src>

<mosaic_0001>
module attributes {stable_mosaic.version = 11 : i64} {
  func.func @ddsp_fused_kernel(%arg0: i32, %arg1: memref<2x16xf32, #tpu.memory_space<vmem>>, %arg2: memref<72x256xf32, #tpu.memory_space<vmem>>, %arg3: memref<1x256xf32, #tpu.memory_space<vmem>>) attributes {dimension_semantics = [#tpu.dimension_semantics<arbitrary>], iteration_bounds = array<i64: 1>, scalar_prefetch = 0 : i64, scratch_operands = 0 : i64, tpu.core_type = #tpu.core_type<tc>, window_params = [{pipeline_mode = #tpu.pipeline_mode<synchronous>, transform_indices = @transform_0, window_bounds = array<i64: 2, 16>}, {pipeline_mode = #tpu.pipeline_mode<synchronous>, transform_indices = @transform_1, window_bounds = array<i64: 72, 256>}, {pipeline_mode = #tpu.pipeline_mode<synchronous>, transform_indices = @transform_2, window_bounds = array<i64: 1, 256>}]} {
    %c0 = arith.constant 0 : index
    %c0_0 = arith.constant 0 : index
    %0 = vector.load %arg1[%c0, %c0_0] : memref<2x16xf32, #tpu.memory_space<vmem>>, vector<2x16xf32>
    %1 = vector.extract_strided_slice %0 {offsets = [0, 0], sizes = [1, 16], strides = [1, 1]} : vector<2x16xf32> to vector<1x16xf32>
    %2 = vector.extract_strided_slice %0 {offsets = [1, 0], sizes = [1, 16], strides = [1, 1]} : vector<2x16xf32> to vector<1x16xf32>
    %c0_1 = arith.constant 0 : index
    %c0_2 = arith.constant 0 : index
    %3 = vector.load %arg2[%c0_1, %c0_2] : memref<72x256xf32, #tpu.memory_space<vmem>>, vector<32x2xf32>
    %c0_3 = arith.constant 0 : index
    %c2 = arith.constant 2 : index
    %4 = vector.load %arg2[%c0_3, %c2] : memref<72x256xf32, #tpu.memory_space<vmem>>, vector<32x1xf32>
    %5 = vector.extract_strided_slice %3 {offsets = [0, 0], sizes = [32, 1], strides = [1, 1]} : vector<32x2xf32> to vector<32x1xf32>
    %6 = vector.broadcast %5 : vector<32x1xf32> to vector<32x16xf32>
    %7 = vector.broadcast %1 : vector<1x16xf32> to vector<32x16xf32>
    %8 = arith.mulf %6, %7 : vector<32x16xf32>
    %9 = vector.extract_strided_slice %3 {offsets = [0, 1], sizes = [32, 1], strides = [1, 1]} : vector<32x2xf32> to vector<32x1xf32>
    %10 = vector.broadcast %9 : vector<32x1xf32> to vector<32x16xf32>
    %11 = vector.broadcast %2 : vector<1x16xf32> to vector<32x16xf32>
    %12 = arith.mulf %10, %11 : vector<32x16xf32>
    %13 = arith.addf %8, %12 : vector<32x16xf32>
    %14 = vector.broadcast %4 : vector<32x1xf32> to vector<32x16xf32>
    %15 = arith.addf %13, %14 : vector<32x16xf32>
    %cst = arith.constant 0.000000e+00 : f32
    %16 = vector.broadcast %cst : f32 to vector<32x16xf32>
    %17 = arith.maximumf %15, %16 : vector<32x16xf32>
    %c32 = arith.constant 32 : index
    %c0_4 = arith.constant 0 : index
    %18 = vector.load %arg2[%c32, %c0_4] : memref<72x256xf32, #tpu.memory_space<vmem>>, vector<8x32xf32>
    %c32_5 = arith.constant 32 : index
    %c32_6 = arith.constant 32 : index
    %19 = vector.load %arg2[%c32_5, %c32_6] : memref<72x256xf32, #tpu.memory_space<vmem>>, vector<8x1xf32>
    %c32_7 = arith.constant 32 : index
    %c33 = arith.constant 33 : index
    %20 = vector.load %arg2[%c32_7, %c33] : memref<72x256xf32, #tpu.memory_space<vmem>>, vector<8x1xf32>
    %cst_8 = arith.constant dense<0.000000e+00> : vector<8x16xf32>
    %21 = tpu.matmul %18, %17, %cst_8 {dimension_numbers = #tpu.dot_dimension_numbers<[1], [0], [0], [1], [0, 0, 1, 1], [], []>, precision = #tpu.contract_precision<fp32>} : vector<8x32xf32>, vector<32x16xf32>, vector<8x16xf32> -> vector<8x16xf32>
    %22 = vector.broadcast %19 : vector<8x1xf32> to vector<8x16xf32>
    %23 = arith.addf %21, %22 : vector<8x16xf32>
    %cst_9 = arith.constant 0.000000e+00 : f32
    %24 = vector.broadcast %cst_9 : f32 to vector<8x16xf32>
    %25 = arith.subf %24, %23 : vector<8x16xf32>
    %cst_10 = arith.constant 0.000000e+00 : f32
    %26 = vector.broadcast %cst_10 : f32 to vector<8x16xf32>
    %27 = arith.maximumf %25, %26 : vector<8x16xf32>
    %28 = math.absf %23 : vector<8x16xf32>
    %cst_11 = arith.constant 0.000000e+00 : f32
    %29 = vector.broadcast %cst_11 : f32 to vector<8x16xf32>
    %30 = arith.subf %29, %28 : vector<8x16xf32>
    %31 = math.exp %30 : vector<8x16xf32>
    %cst_12 = arith.constant 1.000000e+00 : f32
    %32 = vector.broadcast %cst_12 : f32 to vector<8x16xf32>
    %33 = arith.addf %32, %31 : vector<8x16xf32>
    %34 = math.log %33 : vector<8x16xf32>
    %35 = arith.addf %27, %34 : vector<8x16xf32>
    %cst_13 = arith.constant -2.30258512 : f32
    %36 = vector.broadcast %cst_13 : f32 to vector<8x16xf32>
    %37 = arith.mulf %36, %35 : vector<8x16xf32>
    %38 = math.exp %37 : vector<8x16xf32>
    %cst_14 = arith.constant 2.000000e+00 : f32
    %39 = vector.broadcast %cst_14 : f32 to vector<8x16xf32>
    %40 = arith.mulf %39, %38 : vector<8x16xf32>
    %cst_15 = arith.constant 1.000000e-07 : f32
    %41 = vector.broadcast %cst_15 : f32 to vector<8x16xf32>
    %42 = arith.addf %40, %41 : vector<8x16xf32>
    %c40 = arith.constant 40 : index
    %c0_16 = arith.constant 0 : index
    %43 = vector.load %arg2[%c40, %c0_16] : memref<72x256xf32, #tpu.memory_space<vmem>>, vector<16x256xf32>
    %c56 = arith.constant 56 : index
    %c0_17 = arith.constant 0 : index
    %44 = vector.load %arg2[%c56, %c0_17] : memref<72x256xf32, #tpu.memory_space<vmem>>, vector<16x256xf32>
    %cst_18 = arith.constant dense<0.000000e+00> : vector<8x256xf32>
    %45 = tpu.matmul %42, %44, %cst_18 {dimension_numbers = #tpu.dot_dimension_numbers<[1], [0], [0], [1], [0, 0, 1, 1], [], []>, precision = #tpu.contract_precision<fp32>} : vector<8x16xf32>, vector<16x256xf32>, vector<8x256xf32> -> vector<8x256xf32>
    %46 = vector.broadcast %20 : vector<8x1xf32> to vector<8x16xf32>
    %47 = vector.broadcast %1 : vector<1x16xf32> to vector<8x16xf32>
    %48 = arith.mulf %46, %47 : vector<8x16xf32>
    %cst_19 = arith.constant dense<0.000000e+00> : vector<8x256xf32>
    %49 = tpu.matmul %48, %43, %cst_19 {dimension_numbers = #tpu.dot_dimension_numbers<[1], [0], [0], [1], [0, 0, 1, 1], [], []>, precision = #tpu.contract_precision<fp32>} : vector<8x16xf32>, vector<16x256xf32>, vector<8x256xf32> -> vector<8x256xf32>
    %50 = vector.extract_strided_slice %45 {offsets = [4, 0], sizes = [4, 256], strides = [1, 1]} : vector<8x256xf32> to vector<4x256xf32>
    %51 = vector.extract_strided_slice %49 {offsets = [4, 0], sizes = [4, 256], strides = [1, 1]} : vector<8x256xf32> to vector<4x256xf32>
    %52 = math.sin %51 : vector<4x256xf32>
    %53 = arith.mulf %50, %52 : vector<4x256xf32>
    %54 = vector.extract_strided_slice %45 {offsets = [0, 0], sizes = [4, 256], strides = [1, 1]} : vector<8x256xf32> to vector<4x256xf32>
    %55 = vector.extract_strided_slice %49 {offsets = [0, 0], sizes = [4, 256], strides = [1, 1]} : vector<8x256xf32> to vector<4x256xf32>
    %cst_20 = arith.constant 6.28318548 : f32
    %56 = vector.broadcast %cst_20 : f32 to vector<4x256xf32>
    %57 = arith.mulf %56, %53 : vector<4x256xf32>
    %58 = arith.addf %55, %57 : vector<4x256xf32>
    %59 = math.sin %58 : vector<4x256xf32>
    %60 = arith.mulf %54, %59 : vector<4x256xf32>
    %cst_21 = arith.constant dense<0.000000e+00> : vector<256xf32>
    %61 = vector.multi_reduction <add>, %60, %cst_21 [0] : vector<4x256xf32> to vector<256xf32>
    %62 = vector.shape_cast %61 : vector<256xf32> to vector<1x256xf32>
    %c0_22 = arith.constant 0 : index
    %c0_23 = arith.constant 0 : index
    %63 = vector.load %arg3[%c0_22, %c0_23] : memref<1x256xf32, #tpu.memory_space<vmem>>, vector<1x256xf32>
    tpu.vector_store %arg3[%c0_22, %c0_23], %62 {strides = array<i32>} : memref<1x256xf32, #tpu.memory_space<vmem>>, vector<1x256xf32>,
    return
  }
  func.func @transform_0(%arg0: i32) -> (i32, i32) {
    %c0_i32 = arith.constant 0 : i32
    %c0_i32_0 = arith.constant 0 : i32
    %c0_i32_1 = arith.constant 0 : i32
    return %c0_i32, %c0_i32_0 : i32, i32
  }
  func.func @transform_1(%arg0: i32) -> (i32, i32) {
    %c0_i32 = arith.constant 0 : i32
    %c0_i32_0 = arith.constant 0 : i32
    %c0_i32_1 = arith.constant 0 : i32
    return %c0_i32, %c0_i32_0 : i32, i32
  }
  func.func @transform_2(%arg0: i32) -> (i32, i32) {
    %c0_i32 = arith.constant 0 : i32
    %c0_i32_0 = arith.constant 0 : i32
    %c0_i32_1 = arith.constant 0 : i32
    return %c0_i32, %c0_i32_0 : i32, i32
  }
}

</mosaic_0001>

<bundles_post_ra>
// kernel: ddsp_decoder_forward.1
= control target key start
LH: loop header
LB: loop body
LE: loop exit
PB: predicated region body
PF: predicated region fallthrough
CT: control target
= control target key end

     0   :  { %7 = vsyncpa [#allocation3], 0  ;;  %s2203_s0 = inlined_call_operand.hbm [shape: f32[2,16], index: 0, kind: input, shape index: {}]   ;;  %s2204_s1 = inlined_call_operand.hbm [shape: f32[72,256], index: 1, kind: input, shape index: {}]   ;;  %s2205_s2 = inlined_call_operand.hbm [shape: f32[1,256], index: 2, kind: output, shape index: {}]  }
   0x1   :  { %8 = vsyncpa [#allocation6], 0 }
   0x2   :  { %9 = vsyncpa [#allocation4], 0  ;;  %s15_s11 = sshll.u32 %s2203_s0, 4  ;;  %s1789_s12 = smov [#allocation2]   ;;  %s16_s11 = int_to_ptr.hbm [resolvable:$true] %s15_s11 }
   0x3   :  { %s17_s13 = sshll.u32 %s1789_s12, 4  ;;  %s25_s16 = sshll.u32 %s2204_s1, 4  ;;  %s18_s13 = int_to_ptr.vmem [resolvable:$true] %s17_s13  ;;  %s26_s16 = int_to_ptr.hbm [resolvable:$true] %s25_s16 }
   0x4   :  { %20 = dma.hbm_to_vmem [thread:$0]  %s16_s11, 32, %s18_s13, [#allocation3]  }
   0x5   :  { %s1790_s17 = smov [#allocation5]   ;;  %s1791_s19 = smov 256  }
   0x6   :  { %s27_s18 = sshll.u32 %s1790_s17, 4  ;;  %s1792_s20 = smov 16   ;;  %s28_s18 = int_to_ptr.vmem [resolvable:$true] %s27_s18 }
   0x7   :  { %33 = dma.hbm_to_vmem [thread:$0]  %s26_s16, 2304, %s28_s18, [#allocation6], %s1791_s19, %s1791_s19, %s1792_s20  }
   0x8   :  { %1783 = dma.done.wait [#allocation3], 32  }
   0x9   :  { %1784 = vsyncadd [#allocation3], 4294967264 }
   0xa   :  { %1785 = dma.done.wait [#allocation6], 2304  }
   0xb   :  { %1786 = vsyncadd [#allocation6], 4294964992  ;;  %v1793_v0 = vmov 0   ;;  %v46_v1 = vld [vmem:[#allocation5 + $0x30] sm:$0xff]  ;;  %v45_v2 = vld [vmem:[#allocation5 + $0x20] sm:$0xff]  ;;  %v1794_v4 = vmov 1  }
   0xc   :  { %1696 = vset.pattern.permute.xlu2 %v1793_v0  ;;  %1694 = vset.pattern.permute.xlu1 %v1793_v0  ;;  %v44_v3 = vld [vmem:[#allocation5 + $0x10] sm:$0xff]  ;;  %v43_v5 = vld [vmem:[#allocation5] sm:$0xff]  ;;  %v1795_v6 = vmov 2   ;;  %v42_v11 = vld [vmem:[#allocation2] sm:$0x3]  ;;  %vm127_vm0 = vcmask 261120  }
   0xd   :  { %1692 = vset.pattern.permute.xlu0 %v1793_v0  ;;  %59 = vperm.xlu1 %1694, %v45_v2   ;;  %v1830_v13 = vperm.slane %v42_v11, 0  ;;  %v88_v14 = vperm.slane %v42_v11, 1  ;;  %v121_v21 = vld [vmem:[#allocation5 + $0x40] sm:$0xff]  ;;  %v1796_v36 = vmov 32   ;;  %v1797_v40 = vmov 33   ;;  %s1804_s0 = smov [#allocation7]  }
   0xe   :  { %64 = vperm.xlu0 %1692, %v46_v1   ;;  %54 = vperm.xlu2 %1696, %v44_v3   ;;  %v128_v25 = vsel %vm127_vm0, %v121_v21, 0  ;;  %vm338_vm1 = vcmask 130048   ;;  %s1651_s1 = sshll.u32 %s1804_s0, 4  ;;  %s1653_s23 = sshll.u32 %s2205_s2, 4  ;;  %s1652_s1 = int_to_ptr.vmem [resolvable:$true] %s1651_s1  ;;  %s1654_s23 = int_to_ptr.hbm [resolvable:$true] %s1653_s23 }
   0xf   :  { %v1834_v30 = vand.u32 4294901760, %v128_v25 }
  0x11   :  { %v151_v39 = vsub.f32 %v128_v25, %v1834_v30  ;;  %v334_v25 = vld [vmem:[#allocation5 + $0x70] sm:$0xff] }
  0x13   :  { %v152_v50 = vand.u32 4294901760, %v151_v39 }
  0x15   :  { %1695 = vset.pattern.permute.xlu1 %v1794_v4  ;;  %v153_v58 = vsub.f32 %v151_v39, %v152_v50 }
  0x16   :  { %1693 = vset.pattern.permute.xlu0 %v1794_v4  ;;  %1697 = vset.pattern.permute.xlu2 %v1794_v4 }
  0x17   :  { %85 = vperm.xlu0 %1693, %v46_v1   ;;  %81 = vperm.xlu1 %1695, %v45_v2   ;;  %v154_v63 = vand.u32 4294901760, %v153_v58  ;;  %v332_v58 = vld [vmem:[#allocation5 + $0x60] sm:$0xff] }
  0x18   :  { %77 = vperm.xlu2 %1697, %v44_v3  }
  0x1f   :  { %73 = vperm.xlu0 %1693, %v43_v5   ;;  %1698 = vset.pattern.permute.xlu1 %v1795_v6 }
  0x20   :  { %1699 = vset.pattern.permute.xlu2 %v1793_v0  ;;  %110 = vperm.xlu1 %1698, %v46_v1  }
  0x21   :  { %49 = vperm.xlu2 %1699, %v43_v5  }
  0x27   :  { %1701 = vset.pattern.permute.xlu0 %v1795_v6 }
  0x28   :  { %98 = vperm.xlu0 %1701, %v43_v5   ;;  %106 = vperm.xlu1 %1698, %v45_v2  }
  0x29   :  { %1700 = vset.pattern.permute.xlu2 %v1795_v6 }
  0x2a   :  { %102 = vperm.xlu2 %1700, %v44_v3  }
  0x30   :  { %1702 = vset.pattern.permute.xlu1 %v1796_v36  ;;  %1704 = vset.pattern.permute.xlu0 %v1797_v40 }
  0x31   :  { %124 = vperm.xlu1 %1702, %v121_v21  }
  0x32   :  { %1703 = vset.pattern.permute.xlu2 %v1797_v40 }
  0x33   :  { %661 = vperm.xlu2 %1703, %v121_v21  }
  0x68   :  { %v55_v7 = vpop.permute.xlu2 %54 }
  0x69   :  { %v69_v16 = vmul.f32 %v1830_v13, %v55_v7 }
  0x72   :  { %v78_v8 = vpop.permute.xlu2 %77 }
  0x73   :  { %v90_v17 = vmul.f32 %v88_v14, %v78_v8 }
  0x75   :  { %v94_v19 = vadd.f32 %v90_v17, %v69_v16 }
  0x7b   :  { %v50_v12 = vpop.permute.xlu2 %49 }
  0x7c   :  { %v68_v31 = vmul.f32 %v1830_v13, %v50_v12 }
  0x7f   :  { %v60_v9 = vpop.permute.xlu1 %59 }
  0x80   :  { %v65_v10 = vpop.permute.xlu0 %64  ;;  %v70_v37 = vmul.f32 %v1830_v13, %v60_v9 }
  0x81   :  { %v71_v23 = vmul.f32 %v1830_v13, %v65_v10 }
  0x84   :  { %v103_v22 = vpop.permute.xlu2 %102 }
  0x85   :  { %v114_v26 = vadd.f32 %v103_v22, %v94_v19  ;;  %v336_v22 = vld [vmem:[#allocation5 + $0x80] sm:$0xff] }
  0x87   :  { %v118_v33 = vmax.f32 %v114_v26, 0.0 }
  0x89   :  { %v86_v15 = vpop.permute.xlu0 %85  ;;  %v82_v18 = vpop.permute.xlu1 %81  ;;  %v146_v42 = vand.u32 4294901760, %v118_v33 }
  0x8a   :  { %v92_v20 = vmul.f32 %v88_v14, %v86_v15  ;;  %v91_v34 = vmul.f32 %v88_v14, %v82_v18 }
  0x8b   :  { %v184_v52 = vsub.f32 %v118_v33, %v146_v42 }
  0x8c   :  { %v96_v27 = vadd.f32 %v92_v20, %v71_v23  ;;  %v95_v44 = vadd.f32 %v91_v34, %v70_v37  ;;  %v337_v37 = vld [vmem:[#allocation5 + $0x88] sm:$0xff] }
  0x8d   :  { %v185_v61 = vand.u32 4294901760, %v184_v52 }
  0x8f   :  { %v186_v3 = vsub.f32 %v184_v52, %v185_v61 }
  0x91   :  { %v74_v24 = vpop.permute.xlu0 %73  ;;  %v187_v6 = vand.u32 4294901760, %v186_v3 }
  0x92   :  { %v111_v28 = vpop.permute.xlu1 %110  ;;  %v89_v32 = vmul.f32 %v88_v14, %v74_v24  ;;  %v356_v24 = vand.u32 4294901760, %v336_v22 }
  0x93   :  { %v116_v29 = vadd.f32 %v111_v28, %v96_v27  ;;  %v358_v28 = vand.u32 4294901760, %v334_v25 }
  0x94   :  { %v93_v41 = vadd.f32 %v89_v32, %v68_v31  ;;  %v384_v27 = vsub.f32 %v336_v22, %v356_v24 }
  0x95   :  { %v120_v35 = vmax.f32 %v116_v29, 0.0  ;;  %v390_v31 = vsub.f32 %v334_v25, %v358_v28 }
  0x97   :  { %v142_v38 = vand.u32 4294901760, %v120_v35  ;;  %v391_v33 = vand.u32 4294901760, %v390_v31 }
  0x99   :  { %v172_v43 = vsub.f32 %v120_v35, %v142_v38  ;;  %143 = vmatpush.msra.mxu0 %v142_v38  ;;  %243 = vmatpush.msra.mxu3 %v142_v38  ;;  %v392_v35 = vsub.f32 %v390_v31, %v391_v33 }
  0x9a   :  { %v99_v45 = vpop.permute.xlu0 %98  ;;  %v107_v46 = vpop.permute.xlu1 %106 }
  0x9b   :  { %v113_v47 = vadd.f32 %v99_v45, %v93_v41  ;;  %v115_v48 = vadd.f32 %v107_v46, %v95_v44  ;;  %214 = vmatpush.msra.mxu2 %v172_v43  ;;  %v173_v49 = vand.u32 4294901760, %v172_v43  ;;  %v393_v36 = vand.u32 4294901760, %v392_v35  ;;  %v335_v41 = vld [vmem:[#allocation5 + $0x78] sm:$0xff] }
  0x9d   :  { %v117_v51 = vmax.f32 %v113_v47, 0.0  ;;  %v119_v53 = vmax.f32 %v115_v48, 0.0  ;;  %v174_v54 = vsub.f32 %v172_v43, %v173_v49  ;;  %v517_v43 = vand.u32 4294901760, %v335_v41 }
  0x9f   :  { %v148_v55 = vand.u32 4294901760, %v117_v51  ;;  %v144_v56 = vand.u32 4294901760, %v119_v53  ;;  %v175_v57 = vand.u32 4294901760, %v174_v54  ;;  %v549_v45 = vsub.f32 %v335_v41, %v517_v43 }
  0xa1   :  { %v190_v59 = vsub.f32 %v117_v51, %v148_v55  ;;  %v178_v60 = vsub.f32 %v119_v53, %v144_v56  ;;  %145 = vmatpush.msra.mxu0 %v144_v56  ;;  %176 = vmatpush.msra.mxu1 %v175_v57  ;;  %v550_v48 = vand.u32 4294901760, %v549_v45 }
  0xa2   :  { %245 = vmatpush.msra.mxu3 %v144_v56 }
  0xa3   :  { %147 = vmatpush.msra.mxu0 %v146_v42  ;;  %217 = vmatpush.msra.mxu2 %v178_v60  ;;  %v179_v62 = vand.u32 4294901760, %v178_v60  ;;  %v191_v1 = vand.u32 4294901760, %v190_v59  ;;  %v125_v8 = vpop.permute.xlu1 %124 }
  0xa4   :  { %247 = vmatpush.msra.mxu3 %v146_v42 }
  0xa5   :  { %149 = vmatpush.msra.mxu0 %v148_v55  ;;  %220 = vmatpush.msra.mxu2 %v184_v52  ;;  %v180_v2 = vsub.f32 %v178_v60, %v179_v62  ;;  %v192_v5 = vsub.f32 %v190_v59, %v191_v1  ;;  %v682_v60 = vand.u32 4294901760, %v332_v58 }
  0xa6   :  { %249 = vmatpush.msra.mxu3 %v148_v55  ;;  %155 = vmatmul.f32.vlgmr.msra.gmra.mxu0 %v154_v63 }
  0xa7   :  { %272 = vmatpush.msrb.mxu0 %v173_v49  ;;  %223 = vmatpush.msra.mxu2 %v190_v59  ;;  %v181_v4 = vand.u32 4294901760, %v180_v2  ;;  %v193_v7 = vand.u32 4294901760, %v192_v5  ;;  %v330_v59 = vld [vmem:[#allocation5 + $0x50] sm:$0xff] }
  0xa8   :  { %226 = vmatmul.f32.vlgmr.msra.gmra.mxu2 %v151_v39  ;;  %253 = vmatmul.f32.vlgmr.msra.gmra.mxu3 %v152_v50  ;;  %v515_v39 = vand.u32 4294901760, %v337_v37  ;;  %v551_v50 = vsub.f32 %v549_v45, %v550_v48 }
  0xa9   :  { %276 = vmatpush.msrb.mxu0 %v179_v62  ;;  %182 = vmatpush.msra.mxu1 %v181_v4 }
  0xaa   :  { %357 = vmatpush.msrb.mxu2 %v356_v24  ;;  %v552_v54 = vand.u32 4294901760, %v551_v50 }
  0xab   :  { %280 = vmatpush.msrb.mxu0 %v185_v61  ;;  %188 = vmatpush.msra.mxu1 %v187_v6  ;;  %v684_v61 = vand.u32 4294901760, %v330_v59 }
  0xac   :  { %359 = vmatpush.msrb.mxu2 %v358_v28 }
  0xad   :  { %284 = vmatpush.msrb.mxu0 %v191_v1  ;;  %194 = vmatpush.msra.mxu1 %v193_v7  ;;  %v1842_v1 = vsub.f32 %v332_v58, %v682_v60  ;;  %v1844_v3 = vsub.f32 %v330_v59, %v684_v61  ;;  %v333_v7 = vld [vmem:[#allocation5 + $0x68] sm:$0xff] }
  0xae   :  { %196 = vmatmul.f32.vlgmr.msra.gmra.mxu1 %v1834_v30  ;;  %286 = vmatmul.f32.vlgmr.msrb.gmra.mxu0 %v1834_v30 }
  0xaf   :  { %303 = vmatpush.msrb.mxu1 %v142_v38  ;;  %416 = vmatpush.msra.mxu0 %v384_v27  ;;  %v711_v5 = vand.u32 4294901760, %v1842_v1 }
  0xb1   :  { %305 = vmatpush.msrb.mxu1 %v144_v56  ;;  %419 = vmatpush.msra.mxu0 %v390_v31 }
  0xb3   :  { %307 = vmatpush.msrb.mxu1 %v146_v42  ;;  %516 = vmatpush.msrb.mxu0 %v515_v39  ;;  %v543_v42 = vsub.f32 %v337_v37, %v515_v39 }
  0xb5   :  { %309 = vmatpush.msrb.mxu1 %v148_v55  ;;  %518 = vmatpush.msrb.mxu0 %v517_v43  ;;  %v544_v44 = vand.u32 4294901760, %v543_v42 }
  0xb6   :  { %311 = vmatmul.f32.vlgmr.msrb.gmra.mxu1 %v1834_v30  ;;  %v385_v30 = vand.u32 4294901760, %v384_v27 }
  0xb7   :  { %441 = vmatpush.msra.mxu1 %v356_v24  ;;  %v545_v47 = vsub.f32 %v543_v42, %v544_v44 }
  0xb8   :  { %v386_v32 = vsub.f32 %v384_v27, %v385_v30  ;;  %468 = vmatpush.msra.mxu2 %v385_v30 }
  0xb9   :  { %443 = vmatpush.msra.mxu1 %v358_v28  ;;  %v546_v49 = vand.u32 4294901760, %v545_v47 }
  0xba   :  { %v387_v34 = vand.u32 4294901760, %v386_v32  ;;  %472 = vmatpush.msra.mxu2 %v391_v33 }
  0xbb   :  { %547 = vmatpush.msrb.mxu1 %v546_v49 }
  0xbc   :  { %388 = vmatpush.msrb.mxu3 %v387_v34 }
  0xbd   :  { %553 = vmatpush.msrb.mxu1 %v552_v54 }
  0xbe   :  { %394 = vmatpush.msrb.mxu3 %v393_v36 }
  0xc0   :  { %493 = vmatpush.msra.mxu3 %v356_v24 }
  0xc2   :  { %495 = vmatpush.msra.mxu3 %v358_v28 }
 0x123   :  { %v156_v9 = vpop.f32.mrf.mxu0 }
 0x124   :  { %v157_v10 = vadd.f32 %v156_v9, %v125_v8  ;;  %v717_v8 = vand.u32 4294901760, %v1844_v3 }
 0x12b   :  { %v197_v11 = vpop.f32.mrf.mxu1  ;;  %v227_v12 = vpop.f32.mrf.mxu2 }
 0x12c   :  { %v198_v14 = vadd.f32 %v197_v11, %v157_v10  ;;  %v254_v15 = vpop.f32.mrf.mxu3  ;;  %v287_v17 = vpop.f32.mrf.mxu0  ;;  %v331_v10 = vld [vmem:[#allocation5 + $0x58] sm:$0xff]  ;;  %v712_v11 = vsub.f32 %v1842_v1, %v711_v5 }
 0x12e   :  { %v228_v16 = vadd.f32 %v227_v12, %v198_v14  ;;  %v841_v12 = vand.u32 4294901760, %v333_v7 }
 0x130   :  { %v255_v18 = vadd.f32 %v254_v15, %v228_v16  ;;  %v718_v15 = vsub.f32 %v1844_v3, %v717_v8  ;;  %v843_v16 = vand.u32 4294901760, %v331_v10 }
 0x132   :  { %v288_v19 = vadd.f32 %v287_v17, %v255_v18  ;;  %v662_v18 = vpop.permute.xlu2 %661  ;;  %v875_v24 = vsub.f32 %v331_v10, %v843_v16 }
 0x133   :  { %v312_v20 = vpop.f32.mrf.mxu1  ;;  %v664_v22 = vmul.f32 %v662_v18, %v1830_v13 }
 0x134   :  { %v313_v21 = vadd.f32 %v312_v20, %v288_v19  ;;  %v713_v19 = vand.u32 4294901760, %v712_v11  ;;  %v869_v20 = vsub.f32 %v333_v7, %v841_v12  ;;  %v876_v27 = vand.u32 4294901760, %v875_v24 }
 0x136   :  { %v317_v23 = vand.u32 2147483647, %v313_v21  ;;  %v315_v46 = vsub.f32 0.0, %v313_v21  ;;  %v870_v25 = vand.u32 4294901760, %v869_v20 }
 0x138   :  { %v318_v26 = vsub.f32 0.0, %v317_v23  ;;  %v316_v52 = vmax.f32 %v315_v46, 0.0  ;;  %v719_v23 = vand.u32 4294901760, %v718_v15  ;;  %v871_v28 = vsub.f32 %v869_v20, %v870_v25 }
 0x13a   :  { %v319_v29 = vmul.f32 1.442695, %v318_v26  ;;  %v666_v26 = vsel %vm338_vm1, %v664_v22, 0  ;;  %v872_v30 = vand.u32 4294901760, %v871_v28 }
 0x13b   :  { %v686_v13 = vand.u32 4294901760, %v666_v26 }
 0x13c   :  { %1705 = vpow2.f32 %v319_v29  ;;  %v877_v29 = vsub.f32 %v875_v24, %v876_v27 }
 0x13d   :  { %v687_v31 = vsub.f32 %v666_v26, %v686_v13 }
 0x13e   :  { %v878_v32 = vand.u32 4294901760, %v877_v29 }
 0x13f   :  { %v688_v33 = vand.u32 4294901760, %v687_v31 }
 0x141   :  { %v689_v34 = vsub.f32 %v687_v31, %v688_v33 }
 0x142   :  { %v1706_v38 = vpop.eup %1705 }
 0x143   :  { %v321_v40 = vadd.f32 1.0, %v1706_v38  ;;  %v690_v35 = vand.u32 4294901760, %v689_v34  ;;  %v1800_v34 = vmov 2131351028  }
 0x145   :  { %1707 = vlog2.f32 %v321_v40 }
 0x14b   :  { %v1708_v51 = vpop.eup %1707 }
 0x14c   :  { %v323_v53 = vmul.f32 0.6931472, %v1708_v51 }
 0x14e   :  { %v324_v55 = vadd.f32 %v323_v53, %v316_v52 }
 0x150   :  { %v325_v56 = vmul.f32 -2.3025851, %v324_v55 }
 0x152   :  { %v326_v57 = vmul.f32 1.442695, %v325_v56 }
 0x154   :  { %1709 = vpow2.f32 %v326_v57 }
 0x15a   :  { %v1710_v62 = vpop.eup %1709 }
 0x15b   :  { %v328_v63 = vmul.f32 2.0, %v1710_v62 }
 0x15d   :  { %v329_v2 = vadd.f32 1e-07, %v328_v63 }
 0x15f   :  { %v340_v4 = vsel %vm338_vm1, %v329_v2, 0 }
 0x160   :  { %v360_v6 = vand.u32 4294901760, %v340_v4 }
 0x162   :  { %396 = vmatmul.f32.vlgmr.msrb.gmra.mxu3 %v360_v6  ;;  %v361_v9 = vsub.f32 %v340_v4, %v360_v6 }
 0x163   :  { %600 = vmatpush.msrb.mxu3 %v515_v39 }
 0x164   :  { %422 = vmatmul.f32.vlgmr.msra.gmra.mxu0 %v361_v9  ;;  %v362_v14 = vand.u32 4294901760, %v361_v9 }
 0x165   :  { %602 = vmatpush.msrb.mxu3 %v517_v43  ;;  %627 = vmatpush.msra.mxu0 %v544_v44 }
 0x166   :  { %447 = vmatmul.f32.vlgmr.msra.gmra.mxu1 %v362_v14  ;;  %v363_v17 = vsub.f32 %v361_v9, %v362_v14 }
 0x167   :  { %631 = vmatpush.msra.mxu0 %v550_v48  ;;  %652 = vmatpush.msra.mxu1 %v515_v39 }
 0x168   :  { %v364_v21 = vand.u32 4294901760, %v363_v17 }
 0x169   :  { %654 = vmatpush.msra.mxu1 %v517_v43 }
 0x16a   :  { %365 = vmatmul.f32.vlgmr.msrb.gmra.mxu2 %v364_v21  ;;  %497 = vmatmul.f32.vlgmr.msra.gmra.mxu3 %v360_v6 }
 0x16b   :  { %575 = vmatpush.msrb.mxu2 %v543_v42  ;;  %714 = vmatpush.msra.mxu3 %v713_v19 }
 0x16c   :  { %524 = vmatmul.f32.vlgmr.msrb.gmra.mxu0 %v364_v21 }
 0x16d   :  { %578 = vmatpush.msrb.mxu2 %v549_v45  ;;  %720 = vmatpush.msra.mxu3 %v719_v23 }
 0x16e   :  { %555 = vmatmul.f32.vlgmr.msrb.gmra.mxu1 %v360_v6  ;;  %742 = vmatpush.msrb.mxu0 %v1842_v1 }
 0x16f   :  { %767 = vmatpush.msrb.mxu1 %v682_v60 }
 0x170   :  { %745 = vmatpush.msrb.mxu0 %v1844_v3 }
 0x171   :  { %769 = vmatpush.msrb.mxu1 %v684_v61 }
 0x172   :  { %474 = vmatmul.f32.vlgmr.msra.gmra.mxu2 %v360_v6  ;;  %606 = vmatmul.f32.vlgmr.msrb.gmra.mxu3 %v362_v14 }
 0x173   :  { %683 = vmatpush.msra.mxu2 %v682_v60  ;;  %819 = vmatpush.msrb.mxu3 %v682_v60 }
 0x174   :  { %633 = vmatmul.f32.vlgmr.msra.gmra.mxu0 %v360_v6 }
 0x175   :  { %685 = vmatpush.msra.mxu2 %v684_v61  ;;  %821 = vmatpush.msrb.mxu3 %v684_v61 }
 0x176   :  { %656 = vmatmul.f32.vlgmr.msra.gmra.mxu1 %v360_v6  ;;  %842 = vmatpush.msra.mxu0 %v841_v12 }
 0x177   :  { %873 = vmatpush.msra.mxu1 %v872_v30  ;;  %v1799_v30 = vmov 2475754826  }
 0x178   :  { %844 = vmatpush.msra.mxu0 %v843_v16 }
 0x179   :  { %879 = vmatpush.msra.mxu1 %v878_v32 }
 0x17a   :  { %581 = vmatmul.f32.vlgmr.msrb.gmra.mxu2 %v361_v9  ;;  %722 = vmatmul.f32.vlgmr.msra.gmra.mxu3 %v686_v13 }
 0x17b   :  { %794 = vmatpush.msrb.mxu2 %v711_v5  ;;  %926 = vmatpush.msra.mxu3 %v841_v12 }
 0x17c   :  { %748 = vmatmul.f32.vlgmr.msrb.gmra.mxu0 %v687_v31 }
 0x17d   :  { %798 = vmatpush.msrb.mxu2 %v717_v8  ;;  %928 = vmatpush.msra.mxu3 %v843_v16 }
 0x17e   :  { %773 = vmatmul.f32.vlgmr.msrb.gmra.mxu1 %v688_v33  ;;  %953 = vmatpush.msrb.mxu0 %v870_v25 }
 0x17f   :  { %978 = vmatpush.msrb.mxu1 %v841_v12 }
 0x180   :  { %957 = vmatpush.msrb.mxu0 %v876_v27 }
 0x181   :  { %980 = vmatpush.msrb.mxu1 %v843_v16 }
 0x182   :  { %691 = vmatmul.f32.vlgmr.msra.gmra.mxu2 %v690_v35  ;;  %823 = vmatmul.f32.vlgmr.msrb.gmra.mxu3 %v686_v13 }
 0x183   :  { %901 = vmatpush.msra.mxu2 %v869_v20 }
 0x184   :  { %850 = vmatmul.f32.vlgmr.msra.gmra.mxu0 %v690_v35 }
 0x185   :  { %904 = vmatpush.msra.mxu2 %v875_v24 }
 0x186   :  { %881 = vmatmul.f32.vlgmr.msra.gmra.mxu1 %v686_v13 }
 0x18a   :  { %800 = vmatmul.f32.vlgmr.msrb.gmra.mxu2 %v686_v13  ;;  %932 = vmatmul.f32.vlgmr.msra.gmra.mxu3 %v688_v33 }
 0x18c   :  { %959 = vmatmul.f32.vlgmr.msrb.gmra.mxu0 %v686_v13 }
 0x18e   :  { %982 = vmatmul.f32.vlgmr.msrb.gmra.mxu1 %v686_v13  ;;  %v1798_v13 = vmov 683565275  }
 0x192   :  { %907 = vmatmul.f32.vlgmr.msra.gmra.mxu2 %v687_v31 }
 0x1e1   :  { %v423_v36 = vpop.f32.mrf.mxu0 }
 0x1e3   :  { %v448_v37 = vpop.f32.mrf.mxu1 }
 0x1e5   :  { %v397_v38 = vpop.f32.mrf.mxu3 }
 0x1e9   :  { %v525_v39 = vpop.f32.mrf.mxu0 }
 0x1eb   :  { %v556_v40 = vpop.f32.mrf.mxu1 }
 0x1ec   :  { %v557_v41 = vadd.f32 %v556_v40, %v525_v39  ;;  %v1802_v40 = vmov 920167782  }
 0x1ed   :  { %v366_v42 = vpop.f32.mrf.mxu2  ;;  %v498_v44 = vpop.f32.mrf.mxu3 }
 0x1ee   :  { %v398_v43 = vadd.f32 %v397_v38, %v366_v42 }
 0x1f0   :  { %v424_v45 = vadd.f32 %v423_v36, %v398_v43  ;;  %v1803_v43 = vmov 1326507024  }
 0x1f1   :  { %v634_v51 = vpop.f32.mrf.mxu0 }
 0x1f2   :  { %v449_v46 = vadd.f32 %v448_v37, %v424_v45  ;;  %v1801_v37 = vmov 2102212464  }
 0x1f3   :  { %v657_v52 = vpop.f32.mrf.mxu1 }
 0x1f5   :  { %v475_v47 = vpop.f32.mrf.mxu2  ;;  %v607_v50 = vpop.f32.mrf.mxu3 }
 0x1f6   :  { %v476_v48 = vadd.f32 %v475_v47, %v449_v46 }
 0x1f8   :  { %v1863_v49 = vadd.f32 %v498_v44, %v476_v48 }
 0x1f9   :  { %v749_v60 = vpop.f32.mrf.mxu0 }
 0x1fb   :  { %v774_v62 = vpop.f32.mrf.mxu1 }
 0x1fd   :  { %v582_v53 = vpop.f32.mrf.mxu2  ;;  %v723_v57 = vpop.f32.mrf.mxu3 }
 0x1fe   :  { %v583_v54 = vadd.f32 %v582_v53, %v557_v41 }
 0x200   :  { %v608_v55 = vadd.f32 %v607_v50, %v583_v54 }
 0x201   :  { %v851_v5 = vpop.f32.mrf.mxu0 }
 0x202   :  { %v635_v56 = vadd.f32 %v634_v51, %v608_v55 }
 0x203   :  { %v882_v7 = vpop.f32.mrf.mxu1 }
 0x204   :  { %v1865_v58 = vadd.f32 %v657_v52, %v635_v56  ;;  %v883_v10 = vadd.f32 %v882_v7, %v851_v5 }
 0x205   :  { %v692_v59 = vpop.f32.mrf.mxu2  ;;  %v824_v2 = vpop.f32.mrf.mxu3 }
 0x206   :  { %v724_v61 = vadd.f32 %v723_v57, %v692_v59 }
 0x208   :  { %v750_v63 = vadd.f32 %v749_v60, %v724_v61 }
 0x209   :  { %v960_v20 = vpop.f32.mrf.mxu0 }
 0x20a   :  { %v775_v1 = vadd.f32 %v774_v62, %v750_v63 }
 0x20b   :  { %v983_v25 = vpop.f32.mrf.mxu1 }
 0x20d   :  { %v801_v3 = vpop.f32.mrf.mxu2  ;;  %v933_v17 = vpop.f32.mrf.mxu3 }
 0x20e   :  { %v802_v4 = vadd.f32 %v801_v3, %v775_v1 }
 0x210   :  { %v1867_v6 = vadd.f32 %v824_v2, %v802_v4 }
 0x212   :  { %v986_v8 = vand.u32 2147483647, %v1867_v6  ;;  %v989_v9 = vand.u32 2139095040, %v1867_v6 }
 0x214   :  { %v990_v11 = vshrl.u32 %v989_v9, 23  ;;  %v993_v15 = vand.u32 8388607, %v986_v8 }
 0x215   :  { %v908_v12 = vpop.f32.mrf.mxu2 }
 0x216   :  { %v1664_v14 = vadd.s32 4294967169, %v990_v11  ;;  %v909_v16 = vadd.f32 %v908_v12, %v883_v10  ;;  %v994_v21 = vor.u32 8388608, %v993_v15 }
 0x218   :  { %v996_v18 = vadd.s32 1, %v1664_v14  ;;  %v934_v19 = vadd.f32 %v933_v17, %v909_v16  ;;  %v1873_v27 = vshll.u32 %v994_v21, 8 }
 0x21a   :  { %vm997_vm2 = vcmp.gt.s32.totalorder %v996_v18, 0  ;;  %v961_v23 = vadd.f32 %v960_v20, %v934_v19  ;;  %v1035_v56 = vand.u32 65535, %v1873_v27  ;;  %v1036_v63 = vshrl.u32 %v1873_v27, 16 }
 0x21b   :  { %v998_v22 = vsel %vm997_vm2, %v996_v18, 0 }
 0x21c   :  { %v1000_v24 = vand.u32 31, %v998_v22  ;;  %v1875_v28 = vshrl.u32 %v998_v22, 5  ;;  %v1879_v32 = vadd.f32 %v983_v25, %v961_v23 }
 0x21e   :  { %v1001_v26 = vsub.s32 32, %v1000_v24  ;;  %v1003_v29 = vshll.u32 %v1798_v13, %v1000_v24  ;;  %v1006_v31 = vshll.u32 %v1799_v30, %v1000_v24  ;;  %v1009_v36 = vshll.u32 %v1800_v34, %v1000_v24 }
 0x21f   :  { %v1012_v39 = vshll.u32 %v1801_v37, %v1000_v24  ;;  %v1015_v42 = vshll.u32 %v1802_v40, %v1000_v24  ;;  %vm1018_vm3 = vcmp.lt.s32.totalorder %v1875_v28, 1  ;;  %v1144_v51 = vand.u32 2139095040, %v1879_v32 }
 0x220   :  { %v1004_v33 = vshrl.u32 %v1799_v30, %v1001_v26  ;;  %v1007_v35 = vshrl.u32 %v1800_v34, %v1001_v26  ;;  %v1010_v38 = vshrl.u32 %v1801_v37, %v1001_v26  ;;  %v1013_v41 = vshrl.u32 %v1802_v40, %v1001_v26 }
 0x221   :  { %v1016_v44 = vshrl.u32 %v1803_v43, %v1001_v26  ;;  %vm1021_vm4 = vcmp.lt.s32.totalorder %v1875_v28, 4  ;;  %vm1020_vm5 = vcmp.lt.s32.totalorder %v1875_v28, 3  ;;  %vm1019_vm6 = vcmp.lt.s32.totalorder %v1875_v28, 2 }
 0x222   :  { %v1005_v45 = vor.u32 %v1004_v33, %v1003_v29  ;;  %v1008_v46 = vor.u32 %v1007_v35, %v1006_v31  ;;  %v1011_v47 = vor.u32 %v1010_v38, %v1009_v36  ;;  %v1014_v48 = vor.u32 %v1013_v41, %v1012_v39 }
 0x223   :  { %v1017_v50 = vor.u32 %v1016_v44, %v1015_v42  ;;  %v1145_v60 = vshrl.u32 %v1144_v51, 23  ;;  %v1141_v1 = vand.u32 2147483647, %v1879_v32  ;;  %v1002_v7 = vshrl.u32 %v1798_v13, %v1001_v26 }
 0x224   :  { %v1026_v52 = vsel %vm1018_vm3, %v1005_v45, %v1008_v46  ;;  %v1030_v53 = vsel %vm1018_vm3, %v1008_v46, %v1011_v47  ;;  %v1027_v54 = vsel %vm1021_vm4, %v1014_v48, 920167782  ;;  %v1023_v9 = vsel %vm1021_vm4, %v1011_v47, 2102212464 }
 0x225   :  { %v1031_v55 = vsel %vm1021_vm4, %v1017_v50, 1326507024  ;;  %v1028_v57 = vsel %vm1020_vm5, %v1011_v47, %v1027_v54  ;;  %v1667_v12 = vadd.s32 4294967169, %v1145_v60  ;;  %v1022_v14 = vsel %vm1018_vm3, %v1002_v7, %v1005_v45 }
 0x226   :  { %v1032_v59 = vsel %vm1020_vm5, %v1014_v48, %v1031_v55  ;;  %v1029_v61 = vsel %vm1019_vm6, %v1026_v52, %v1028_v57  ;;  %v1024_v17 = vsel %vm1020_vm5, %v1008_v46, %v1023_v9  ;;  %v1148_v20 = vand.u32 8388607, %v1141_v1 }
 0x227   :  { %v1033_v62 = vsel %vm1019_vm6, %v1030_v53, %v1032_v59  ;;  %v1059_v4 = vand.u32 65535, %v1029_v61  ;;  %v1060_v5 = vshrl.u32 %v1029_v61, 16  ;;  %v1151_v29 = vadd.s32 1, %v1667_v12 }
 0x228   :  { %v1037_v2 = vand.u32 65535, %v1033_v62  ;;  %v1038_v3 = vshrl.u32 %v1033_v62, 16  ;;  %v1025_v47 = vsel %vm1019_vm6, %v1022_v14, %v1024_v17  ;;  %v1149_v55 = vor.u32 8388608, %v1148_v20 }
 0x229   :  { %v1062_v15 = vmul.u32 %v1060_v5, %v1035_v56  ;;  %v1063_v16 = vmul.u32 %v1059_v4, %v1036_v63  ;;  %v1061_v22 = vmul.u32 %v1059_v4, %v1035_v56  ;;  %v1064_v23 = vmul.u32 %v1060_v5, %v1036_v63 }
 0x22a   :  { %v1040_v10 = vmul.u32 %v1038_v3, %v1035_v56  ;;  %v1041_v11 = vmul.u32 %v1037_v2, %v1036_v63  ;;  %v1039_v18 = vmul.u32 %v1037_v2, %v1035_v56  ;;  %v1042_v21 = vmul.u32 %v1038_v3, %v1036_v63 }
 0x22b   :  { %v1065_v24 = vshll.u32 %v1062_v15, 16  ;;  %v1067_v33 = vshll.u32 %v1063_v16, 16  ;;  %vm1152_vm10 = vcmp.gt.s32.totalorder %v1151_v29, 0  ;;  %v1066_v48 = vshrl.u32 %v1062_v15, 16 }
 0x22c   :  { %v1043_v19 = vshll.u32 %v1040_v10, 16  ;;  %v1045_v25 = vshll.u32 %v1041_v11, 16  ;;  %v1044_v42 = vshrl.u32 %v1040_v10, 16  ;;  %v1153_v46 = vsel %vm1152_vm10, %v1151_v29, 0 }
 0x22d   :  { %vm1069_vm8 = vc.u32 %v1061_v22, %v1065_v24  ;;  %v1071_v35 = vadd.s32 %v1065_v24, %v1061_v22  ;;  %v1155_v51 = vand.u32 31, %v1153_v46  ;;  %v1046_v52 = vshrl.u32 %v1041_v11, 16 }
 0x22e   :  { %vm1047_vm7 = vc.u32 %v1039_v18, %v1043_v19  ;;  %v1049_v26 = vadd.s32 %v1043_v19, %v1039_v18  ;;  %v1070_v38 = vsel %vm1069_vm8, 1, %v1793_v0  ;;  %v1068_v54 = vshrl.u32 %v1063_v16, 16 }
 0x22f   :  { %v1048_v31 = vsel %vm1047_vm7, 1, %v1793_v0  ;;  %v1072_v41 = vadd.s32 %v1070_v38, %v1064_v23  ;;  %vm1073_vm11 = vc.u32 %v1071_v35, %v1067_v33  ;;  %v1928_v56 = vadd.s32 %v1071_v35, %v1067_v33 }
 0x230   :  { %v1050_v36 = vadd.s32 %v1048_v31, %v1042_v21  ;;  %vm1051_vm9 = vc.u32 %v1049_v26, %v1045_v25  ;;  %v1074_v45 = vsel %vm1073_vm11, 1, %v1793_v0  ;;  %v1930_v59 = vshrl.u32 %v1153_v46, 5 }
 0x231   :  { %v1052_v39 = vsel %vm1051_vm9, 1, %v1793_v0  ;;  %v1076_v50 = vadd.s32 %v1074_v45, %v1072_v41  ;;  %v1932_v60 = vsub.s32 32, %v1155_v51  ;;  %v1158_v62 = vshll.u32 %v1798_v13, %v1155_v51 }
 0x232   :  { %v1054_v44 = vadd.s32 %v1052_v39, %v1050_v36  ;;  %v1161_v28 = vshll.u32 %v1799_v30, %v1155_v51  ;;  %v1164_v63 = vshll.u32 %v1800_v34, %v1155_v51  ;;  %v1167_v5 = vshll.u32 %v1801_v37, %v1155_v51 }
 0x233   :  { %v1077_v57 = vadd.s32 %v1076_v50, %v1066_v48  ;;  %v1159_v3 = vshrl.u32 %v1799_v30, %v1932_v60  ;;  %v1162_v4 = vshrl.u32 %v1800_v34, %v1932_v60  ;;  %v1165_v7 = vshrl.u32 %v1801_v37, %v1932_v60 }
 0x234   :  { %v1055_v53 = vadd.s32 %v1054_v44, %v1044_v42  ;;  %v1168_v9 = vshrl.u32 %v1802_v40, %v1932_v60  ;;  %v1170_v10 = vshll.u32 %v1802_v40, %v1155_v51  ;;  %v1171_v15 = vshrl.u32 %v1803_v43, %v1932_v60 }
 0x235   :  { %v1078_v2 = vadd.s32 %v1077_v57, %v1068_v54  ;;  %v1951_v12 = vor.u32 %v1159_v3, %v1158_v62  ;;  %v1953_v14 = vor.u32 %v1162_v4, %v1161_v28  ;;  %v1079_v16 = vmul.u32 %v1873_v27, %v1025_v47 }
 0x236   :  { %v1934_v61 = vadd.s32 %v1055_v53, %v1046_v52  ;;  %v1166_v17 = vor.u32 %v1165_v7, %v1164_v63  ;;  %v1169_v18 = vor.u32 %v1168_v9, %v1167_v5  ;;  %v1172_v20 = vor.u32 %v1171_v15, %v1170_v10 }
 0x237   :  { %v1082_v11 = vadd.s32 1, %v1078_v2  ;;  %vm1173_vm13 = vcmp.lt.s32.totalorder %v1930_v59, 1  ;;  %vm1176_vm14 = vcmp.lt.s32.totalorder %v1930_v59, 4  ;;  %v1964_v23 = vshll.u32 %v1149_v55, 8 }
 0x238   :  { %vm1081_vm12 = vc.u32 %v1934_v61, %v1928_v56  ;;  %v1181_v22 = vsel %vm1173_vm13, %v1951_v12, %v1953_v14  ;;  %vm1175_vm15 = vcmp.lt.s32.totalorder %v1930_v59, 3  ;;  %v1182_v27 = vsel %vm1176_vm14, %v1169_v18, 920167782 }
 0x239   :  { %v1083_v19 = vsel %vm1081_vm12, %v1082_v11, %v1078_v2  ;;  %v1185_v24 = vsel %vm1173_vm13, %v1953_v14, %v1166_v17  ;;  %v1186_v25 = vsel %vm1176_vm14, %v1172_v20, 1326507024  ;;  %vm1174_vm0 = vcmp.lt.s32.totalorder %v1930_v59, 2 }
 0x23a   :  { %v1084_v21 = vadd.s32 %v1083_v19, %v1079_v16  ;;  %v1183_v29 = vsel %vm1175_vm15, %v1166_v17, %v1182_v27  ;;  %v1187_v31 = vsel %vm1175_vm15, %v1169_v18, %v1186_v25  ;;  %v1190_v38 = vand.u32 65535, %v1964_v23 }
 0x23b   :  { %v1184_v33 = vsel %vm1174_vm0, %v1181_v22, %v1183_v29  ;;  %v1188_v35 = vsel %vm1174_vm0, %v1185_v24, %v1187_v31  ;;  %v1191_v42 = vshrl.u32 %v1964_v23, 16  ;;  %v1178_v20 = vsel %vm1176_vm14, %v1166_v17, 2102212464 }
 0x23c   :  { %v1085_v26 = vadd.s32 536870912, %v1084_v21  ;;  %v1192_v39 = vand.u32 65535, %v1188_v35  ;;  %v1193_v41 = vshrl.u32 %v1188_v35, 16  ;;  %v1215_v44 = vshrl.u32 %v1184_v33, 16 }
 0x23d   :  { %v1214_v47 = vand.u32 65535, %v1184_v33  ;;  %v1157_v25 = vshrl.u32 %v1798_v13, %v1932_v60  ;;  %v1080_v29 = vadd.s32 %v1928_v56, %v1934_v61  ;;  %vm988_vm8 = vcmp.lt.s32.totalorder %v1867_v6, 0 }
 0x23e   :  { %v1983_v36 = vshrl.u32 %v1085_v26, 30  ;;  %v1195_v46 = vmul.u32 %v1193_v41, %v1190_v38  ;;  %v1196_v48 = vmul.u32 %v1192_v39, %v1191_v42  ;;  %v1217_v50 = vmul.u32 %v1215_v44, %v1190_v38 }
 0x23f   :  { %v1194_v52 = vmul.u32 %v1192_v39, %v1190_v38  ;;  %v1197_v54 = vmul.u32 %v1193_v41, %v1191_v42  ;;  %v1218_v57 = vmul.u32 %v1214_v47, %v1191_v42  ;;  %v1216_v7 = vmul.u32 %v1214_v47, %v1190_v38 }
 0x240   :  { %v1087_v45 = vshll.u32 %v1983_v36, 30  ;;  %v1198_v53 = vshll.u32 %v1195_v46, 16  ;;  %v1200_v62 = vshll.u32 %v1196_v48, 16  ;;  %v1220_v2 = vshll.u32 %v1217_v50, 16 }
 0x241   :  { %v1199_v9 = vshrl.u32 %v1195_v46, 16  ;;  %v1219_v11 = vmul.u32 %v1215_v44, %v1191_v42  ;;  %v1222_v15 = vshll.u32 %v1218_v57, 16  ;;  %v1201_v35 = vshrl.u32 %v1196_v48, 16 }
 0x242   :  { %v1088_v51 = vsub.s32 %v1084_v21, %v1087_v45  ;;  %vm1202_vm2 = vc.u32 %v1194_v52, %v1198_v53  ;;  %v1204_v63 = vadd.s32 %v1198_v53, %v1194_v52  ;;  %vm1224_vm4 = vc.u32 %v1216_v7, %v1220_v2 }
 0x243   :  { %v1203_v28 = vsel %vm1202_vm2, 1, %v1793_v0  ;;  %v1226_v19 = vadd.s32 %v1220_v2, %v1216_v7  ;;  %v1225_v21 = vsel %vm1224_vm4, 1, %v1793_v0  ;;  %v1177_v17 = vsel %vm1173_vm13, %v1157_v25, %v1951_v12 }
 0x244   :  { %vm1089_vm1 = vcmp.lt.s32.totalorder %v1088_v51, 0  ;;  %v1090_v55 = vsub.s32 0, %v1088_v51  ;;  %v1205_v4 = vadd.s32 %v1203_v28, %v1197_v54  ;;  %vm1206_vm3 = vc.u32 %v1204_v63, %v1200_v62 }
 0x245   :  { %v1207_v10 = vsel %vm1206_vm3, 1, %v1793_v0  ;;  %v1227_v27 = vadd.s32 %v1225_v21, %v1219_v11  ;;  %vm1228_vm6 = vc.u32 %v1226_v19, %v1222_v15  ;;  %v1179_v38 = vsel %vm1175_vm15, %v1953_v14, %v1178_v20 }
 0x246   :  { %v1091_v3 = vsel %vm1089_vm1, %v1090_v55, %v1088_v51  ;;  %v1209_v18 = vadd.s32 %v1207_v10, %v1205_v4  ;;  %v1229_v26 = vsel %vm1228_vm6, 1, %v1793_v0  ;;  %v1221_v39 = vshrl.u32 %v1217_v50, 16 }
 0x247   :  { %v1092_v5 = vclz %v1091_v3  ;;  %v1231_v41 = vadd.s32 %v1229_v26, %v1227_v27  ;;  %v1223_v46 = vshrl.u32 %v1218_v57, 16  ;;  %v1230_v52 = vadd.s32 %v1226_v19, %v1222_v15 }
 0x248   :  { %v1210_v22 = vadd.s32 %v1209_v18, %v1199_v9  ;;  %v1180_v48 = vsel %vm1174_vm0, %v1177_v17, %v1179_v38  ;;  %vm2010_vm9 = vcmp.le.f32.partialorder %v986_v8, 0.7853982  ;;  %v1110_v4 = vsub.s32 4, %v1983_v36 }
 0x249   :  { %v1665_v16 = vadd.s32 4294967294, %v1092_v5  ;;  %v1232_v47 = vadd.s32 %v1231_v41, %v1221_v39  ;;  %v1234_v50 = vmul.u32 %v1964_v23, %v1180_v48  ;;  %vm1129_vm15 = vweird.f32 %v1867_v6 }
 0x24a   :  { %v1211_v45 = vadd.s32 %v1210_v22, %v1201_v35  ;;  %v1111_v15 = vsel %vm988_vm8, %v1110_v4, %v1983_v36  ;;  %vm1143_vm0 = vcmp.lt.s32.totalorder %v1879_v32, 0  ;;  %vm1142_vm1 = vcmp.le.f32.partialorder %v1141_v1, 0.7853982 }
 0x24b   :  { %vm1666_vm5 = vcmp.lt.s32.totalorder %v1665_v16, 0  ;;  %v1233_v53 = vadd.s32 %v1232_v47, %v1223_v46  ;;  %v1113_v19 = vsel %vm2010_vm9, 0, %v1111_v15 }
 0x24c   :  { %v1095_v24 = vsel %vm1666_vm5, 0, %v1665_v16  ;;  %vm1236_vm7 = vc.u32 %v1211_v45, %v1230_v52  ;;  %v1130_v26 = vadd.s32 3, %v1113_v19  ;;  %v1235_v39 = vadd.s32 %v1230_v52, %v1211_v45 }
 0x24d   :  { %v1096_v31 = vsub.s32 32, %v1095_v24  ;;  %v1100_v33 = vsub.s32 4294967266, %v1095_v24  ;;  %v1097_v42 = vshll.u32 %v1088_v51, %v1095_v24  ;;  %v1237_v54 = vadd.s32 1, %v1233_v53 }
 0x24e   :  { %v1131_v38 = vand.u32 3, %v1130_v26 }
 0x24f   :  { %v1098_v60 = vshrl.u32 %v1080_v29, %v1096_v31  ;;  %v1101_v44 = vadd.s32 127, %v1100_v33  ;;  %v1238_v51 = vsel %vm1236_vm7, %v1237_v54, %v1233_v53  ;;  %vm1284_vm7 = vweird.f32 %v1879_v32 }
 0x250   :  { %v1239_v28 = vadd.s32 %v1238_v51, %v1234_v50  ;;  %vm1133_vm12 = vcmp.eq.s32.totalorder %v1131_v38, 0  ;;  %vm1136_vm13 = vcmp.eq.s32.totalorder %v1131_v38, 2  ;;  %vm1132_vm14 = vcmp.lt.s32.totalorder %v1131_v38, 2 }
 0x251   :  { %v1099_v56 = vor.u32 %v1098_v60, %v1097_v42  ;;  %v1102_v61 = vshll.u32 %v1101_v44, 23 }
 0x252   :  { %v1240_v57 = vadd.s32 536870912, %v1239_v28 }
 0x253   :  { %v1103_v12 = vor.u32 4788187, %v1102_v61  ;;  %v1106_v14 = vcvt.s32.f32 %v1099_v56 }
 0x254   :  { %v1241_v3 = vshrl.u32 %v1240_v57, 30 }
 0x255   :  { %v1104_v55 = vand.u32 2147483647, %v1103_v12 }
 0x256   :  { %v1242_v7 = vshll.u32 %v1241_v3, 30 }
 0x257   :  { %v1107_v62 = vmul.f32 %v1106_v14, %v1104_v55 }
 0x258   :  { %v1243_v11 = vsub.s32 %v1239_v28, %v1242_v7 }
 0x259   :  { %v1108_v63 = vxor.u32 2147483648, %v1107_v62 }
 0x25a   :  { %vm1244_vm10 = vcmp.lt.s32.totalorder %v1243_v11, 0  ;;  %v1245_v18 = vsub.s32 0, %v1243_v11 }
 0x25b   :  { %v1109_v2 = vsel %vm988_vm8, %v1108_v63, %v1107_v62  ;;  %v1265_v62 = vsub.s32 4, %v1241_v3 }
 0x25c   :  { %v1112_v23 = vsel %vm2010_vm9, %v1867_v6, %v1109_v2  ;;  %v1246_v22 = vsel %vm1244_vm10, %v1245_v18, %v1243_v11 }
 0x25d   :  { %v1114_v5 = vmul.f32 %v1112_v23, %v1112_v23  ;;  %v1247_v27 = vclz %v1246_v22  ;;  %v1266_v2 = vsel %vm1143_vm0, %v1265_v62, %v1241_v3 }
 0x25f   :  { %v1115_v9 = vmul.f32 -0.001358992, %v1114_v5  ;;  %v1122_v10 = vmul.f32 -0.00019511016, %v1114_v5  ;;  %v1668_v29 = vadd.s32 4294967294, %v1247_v27 }
 0x261   :  { %v1116_v16 = vadd.f32 0.041655596, %v1115_v9  ;;  %v1123_v8 = vadd.f32 0.008332121, %v1122_v10  ;;  %vm1669_vm11 = vcmp.lt.s32.totalorder %v1668_v29, 0  ;;  %v1268_v9 = vsel %vm1142_vm1, 0, %v1266_v2 }
 0x262   :  { %v1250_v17 = vsel %vm1669_vm11, 0, %v1668_v29 }
 0x263   :  { %v1117_v20 = vmul.f32 %v1116_v16, %v1114_v5  ;;  %v1124_v21 = vmul.f32 %v1123_v8, %v1114_v5  ;;  %v1251_v41 = vsub.s32 32, %v1250_v17  ;;  %v1255_v42 = vsub.s32 4294967266, %v1250_v17 }
 0x264   :  { %v1252_v46 = vshll.u32 %v1243_v11, %v1250_v17  ;;  %v1285_v8 = vadd.s32 3, %v1268_v9 }
 0x265   :  { %v1118_v24 = vadd.f32 -0.4999988, %v1117_v20  ;;  %v1125_v25 = vadd.f32 -0.16666654, %v1124_v21  ;;  %v1253_v47 = vshrl.u32 %v1235_v39, %v1251_v41  ;;  %v1256_v56 = vadd.s32 127, %v1255_v42 }
 0x266   :  { %v1286_v1 = vand.u32 3, %v1285_v8 }
 0x267   :  { %v1119_v31 = vmul.f32 %v1118_v24, %v1114_v5  ;;  %v1126_v33 = vmul.f32 %v1125_v25, %v1114_v5  ;;  %v1254_v48 = vor.u32 %v1253_v47, %v1252_v46  ;;  %v1257_v53 = vshll.u32 %v1256_v56, 23 }
 0x268   :  { %vm1287_vm3 = vcmp.lt.s32.totalorder %v1286_v1, 2  ;;  %vm1288_vm4 = vcmp.eq.s32.totalorder %v1286_v1, 0  ;;  %vm1291_vm5 = vcmp.eq.s32.totalorder %v1286_v1, 2 }
 0x269   :  { %v1120_v35 = vadd.f32 1.0, %v1119_v31  ;;  %v1127_v36 = vadd.f32 1.0, %v1126_v33  ;;  %v1258_v14 = vor.u32 4788187, %v1257_v53  ;;  %v1261_v51 = vcvt.s32.f32 %v1254_v48 }
 0x26b   :  { %v1128_v60 = vmul.f32 %v1127_v36, %v1112_v23  ;;  %v1137_v44 = vxor.u32 2147483648, %v1120_v35  ;;  %v1259_v50 = vand.u32 2147483647, %v1258_v14 }
 0x26d   :  { %v1134_v61 = vxor.u32 2147483648, %v1128_v60  ;;  %v1138_v54 = vsel %vm1136_vm13, %v1137_v44, %v1128_v60  ;;  %v1262_v63 = vmul.f32 %v1261_v51, %v1259_v50 }
 0x26f   :  { %v1135_v12 = vsel %vm1133_vm12, %v1120_v35, %v1134_v61  ;;  %v1263_v59 = vxor.u32 2147483648, %v1262_v63 }
 0x270   :  { %v1139_v55 = vsel %vm1132_vm14, %v1135_v12, %v1138_v54 }
 0x271   :  { %v1140_v45 = vsel %vm1129_vm15, nan, %v1139_v55  ;;  %v1264_v23 = vsel %vm1143_vm0, %v1263_v59, %v1262_v63 }
 0x272   :  { %v1296_v52 = vmul.f32 %v1140_v45, %v1863_v49  ;;  %v1267_v5 = vsel %vm1142_vm1, %v1879_v32, %v1264_v23 }
 0x273   :  { %v1269_v10 = vmul.f32 %v1267_v5, %v1267_v5 }
 0x274   :  { %v1298_v28 = vmul.f32 6.2831855, %v1296_v52 }
 0x275   :  { %v1270_v15 = vmul.f32 -0.001358992, %v1269_v10  ;;  %v1277_v16 = vmul.f32 -0.00019511016, %v1269_v10 }
 0x276   :  { %v1302_v57 = vrot.slane %v1298_v28, 4 }
 0x277   :  { %v1271_v19 = vadd.f32 0.041655596, %v1270_v15 }
 0x278   :  { %v2025_v4 = vadd.f32 %v1302_v57, %v1867_v6  ;;  %v1278_v6 = vadd.f32 0.008332121, %v1277_v16 }
 0x279   :  { %v1272_v21 = vmul.f32 %v1271_v19, %v1269_v10 }
 0x27a   :  { %v1311_v7 = vand.u32 2139095040, %v2025_v4  ;;  %v1308_v18 = vand.u32 2147483647, %v2025_v4  ;;  %v1279_v22 = vmul.f32 %v1278_v6, %v1269_v10 }
 0x27b   :  { %v1273_v24 = vadd.f32 -0.4999988, %v1272_v21 }
 0x27c   :  { %v1312_v11 = vshrl.u32 %v1311_v7, 23  ;;  %v1315_v27 = vand.u32 8388607, %v1308_v18  ;;  %v1280_v25 = vadd.f32 -0.16666654, %v1279_v22 }
 0x27d   :  { %v1274_v31 = vmul.f32 %v1273_v24, %v1269_v10 }
 0x27e   :  { %v1670_v3 = vadd.s32 4294967169, %v1312_v11  ;;  %v1281_v33 = vmul.f32 %v1280_v25, %v1269_v10  ;;  %v1316_v35 = vor.u32 8388608, %v1315_v27 }
 0x27f   :  { %v1275_v38 = vadd.f32 1.0, %v1274_v31 }
 0x280   :  { %v1318_v20 = vadd.s32 1, %v1670_v3  ;;  %v1282_v39 = vadd.f32 1.0, %v1281_v33  ;;  %v2047_v63 = vshll.u32 %v1316_v35, 8 }
 0x281   :  { %v1292_v56 = vxor.u32 2147483648, %v1275_v38 }
 0x282   :  { %vm1319_vm2 = vcmp.gt.s32.totalorder %v1318_v20, 0  ;;  %v1283_v47 = vmul.f32 %v1282_v39, %v1267_v5  ;;  %v1357_v16 = vand.u32 65535, %v2047_v63  ;;  %v1358_v8 = vshrl.u32 %v2047_v63, 16 }
 0x283   :  { %v1320_v26 = vsel %vm1319_vm2, %v1318_v20, 0 }
 0x284   :  { %v1322_v29 = vand.u32 31, %v1320_v26  ;;  %v2034_v36 = vshrl.u32 %v1320_v26, 5  ;;  %v1289_v55 = vxor.u32 2147483648, %v1283_v47  ;;  %v1293_v28 = vsel %vm1291_vm5, %v1292_v56, %v1283_v47 }
 0x286   :  { %v1323_v17 = vsub.s32 32, %v1322_v29  ;;  %v1325_v41 = vshll.u32 %v1798_v13, %v1322_v29  ;;  %v1328_v42 = vshll.u32 %v1799_v30, %v1322_v29  ;;  %v1331_v60 = vshll.u32 %v1800_v34, %v1322_v29 }
 0x287   :  { %v1334_v44 = vshll.u32 %v1801_v37, %v1322_v29  ;;  %v1337_v61 = vshll.u32 %v1802_v40, %v1322_v29  ;;  %v1290_v62 = vsel %vm1288_vm4, %v1275_v38, %v1289_v55  ;;  %vm1340_vm6 = vcmp.lt.s32.totalorder %v2034_v36, 1 }
 0x288   :  { %v1338_v46 = vshrl.u32 %v1803_v43, %v1323_v17  ;;  %v1326_v48 = vshrl.u32 %v1799_v30, %v1323_v17  ;;  %v1329_v53 = vshrl.u32 %v1800_v34, %v1323_v17  ;;  %v1332_v12 = vshrl.u32 %v1801_v37, %v1323_v17 }
 0x289   :  { %v1335_v54 = vshrl.u32 %v1802_v40, %v1323_v17  ;;  %v1294_v57 = vsel %vm1287_vm3, %v1290_v62, %v1293_v28  ;;  %vm1343_vm8 = vcmp.lt.s32.totalorder %v2034_v36, 4  ;;  %vm1342_vm9 = vcmp.lt.s32.totalorder %v2034_v36, 3 }
 0x28a   :  { %v1339_v14 = vor.u32 %v1338_v46, %v1337_v61  ;;  %v1327_v45 = vor.u32 %v1326_v48, %v1325_v41  ;;  %v1330_v52 = vor.u32 %v1329_v53, %v1328_v42  ;;  %v1333_v50 = vor.u32 %v1332_v12, %v1331_v60 }
 0x28b   :  { %v1336_v51 = vor.u32 %v1335_v54, %v1334_v44  ;;  %v1295_v2 = vsel %vm1284_vm7, nan, %v1294_v57  ;;  %vm1341_vm10 = vcmp.lt.s32.totalorder %v2034_v36, 2  ;;  %v1324_v25 = vshrl.u32 %v1798_v13, %v1323_v17 }
 0x28c   :  { %v1348_v59 = vsel %vm1340_vm6, %v1327_v45, %v1330_v52  ;;  %v1352_v5 = vsel %vm1340_vm6, %v1330_v52, %v1333_v50  ;;  %v1297_v7 = vmul.f32 %v1295_v2, %v1865_v58  ;;  %v1353_v10 = vsel %vm1343_vm8, %v1339_v14, 1326507024 }
 0x28d   :  { %v1349_v23 = vsel %vm1343_vm8, %v1336_v51, 920167782  ;;  %v1354_v15 = vsel %vm1342_vm9, %v1336_v51, %v1353_v10  ;;  %v1345_v33 = vsel %vm1343_vm8, %v1333_v50, 2102212464  ;;  %v1344_v48 = vsel %vm1340_vm6, %v1324_v25, %v1327_v45 }
 0x28e   :  { %v1350_v9 = vsel %vm1342_vm9, %v1333_v50, %v1349_v23  ;;  %v1299_v3 = vmul.f32 6.2831855, %v1297_v7  ;;  %v1355_v19 = vsel %vm1341_vm10, %v1352_v5, %v1354_v15  ;;  %v1346_v54 = vsel %vm1342_vm9, %v1330_v52, %v1345_v33 }
 0x28f   :  { %v1351_v11 = vsel %vm1341_vm10, %v1348_v59, %v1350_v9  ;;  %v1359_v21 = vand.u32 65535, %v1355_v19  ;;  %v1360_v22 = vshrl.u32 %v1355_v19, 16  ;;  %v1347_v52 = vsel %vm1341_vm10, %v1344_v48, %v1346_v54 }
 0x290   :  { %v1381_v6 = vand.u32 65535, %v1351_v11  ;;  %v1382_v20 = vshrl.u32 %v1351_v11, 16  ;;  %v1303_v1 = vrot.slane %v1299_v3, 4 }
 0x291   :  { %v1362_v26 = vmul.u32 %v1360_v22, %v1357_v16  ;;  %v1363_v29 = vmul.u32 %v1359_v21, %v1358_v8  ;;  %v1361_v39 = vmul.u32 %v1359_v21, %v1357_v16  ;;  %v1364_v41 = vmul.u32 %v1360_v22, %v1358_v8 }
 0x292   :  { %v1384_v27 = vmul.u32 %v1382_v20, %v1357_v16  ;;  %v1385_v24 = vmul.u32 %v1381_v6, %v1358_v8  ;;  %v2075_v31 = vadd.f32 %v1303_v1, %v1879_v32  ;;  %v1383_v35 = vmul.u32 %v1381_v6, %v1357_v16 }
 0x293   :  { %v1365_v42 = vshll.u32 %v1362_v26, 16  ;;  %v1386_v60 = vmul.u32 %v1382_v20, %v1358_v8  ;;  %v1367_v46 = vshll.u32 %v1363_v29, 16  ;;  %v1366_v28 = vshrl.u32 %v1362_v26, 16 }
 0x294   :  { %v1387_v38 = vshll.u32 %v1384_v27, 16  ;;  %v1466_v44 = vand.u32 2139095040, %v2075_v31  ;;  %v1389_v47 = vshll.u32 %v1385_v24, 16  ;;  %v1463_v62 = vand.u32 2147483647, %v2075_v31 }
 0x295   :  { %vm1369_vm12 = vc.u32 %v1361_v39, %v1365_v42  ;;  %v1371_v17 = vadd.s32 %v1365_v42, %v1361_v39  ;;  %v1388_v59 = vshrl.u32 %v1384_v27, 16  ;;  %v1368_v23 = vshrl.u32 %v1363_v29, 16 }
 0x296   :  { %vm1391_vm11 = vc.u32 %v1383_v35, %v1387_v38  ;;  %v1393_v32 = vadd.s32 %v1387_v38, %v1383_v35  ;;  %v1467_v61 = vshrl.u32 %v1466_v44, 23  ;;  %v1370_v53 = vsel %vm1369_vm12, 1, %v1793_v0 }
 0x297   :  { %v1392_v56 = vsel %vm1391_vm11, 1, %v1793_v0  ;;  %v1372_v55 = vadd.s32 %v1370_v53, %v1364_v41  ;;  %vm1373_vm13 = vc.u32 %v1371_v17, %v1367_v46  ;;  %v1390_v7 = vshrl.u32 %v1385_v24, 16 }
 0x298   :  { %v1394_v12 = vadd.s32 %v1392_v56, %v1386_v60  ;;  %vm1395_vm14 = vc.u32 %v1393_v32, %v1389_v47  ;;  %v1673_v14 = vadd.s32 4294967169, %v1467_v61  ;;  %v1374_v50 = vsel %vm1373_vm13, 1, %v1793_v0 }
 0x299   :  { %v1396_v51 = vsel %vm1395_vm14, 1, %v1793_v0  ;;  %v1376_v57 = vadd.s32 %v1374_v50, %v1372_v55  ;;  %v1470_v10 = vand.u32 8388607, %v1463_v62  ;;  %v1397_v16 = vadd.s32 %v1393_v32, %v1389_v47 }
 0x29a   :  { %v1398_v45 = vadd.s32 %v1396_v51, %v1394_v12  ;;  %v1473_v2 = vadd.s32 1, %v1673_v14  ;;  %v1401_v21 = vmul.u32 %v2047_v63, %v1347_v52  ;;  %vm1310_vm12 = vcmp.lt.s32.totalorder %v2025_v4, 0 }
 0x29b   :  { %v1377_v5 = vadd.s32 %v1376_v57, %v1366_v28  ;;  %v1471_v22 = vor.u32 8388608, %v1470_v10  ;;  %vm2167_vm13 = vcmp.le.f32.partialorder %v1308_v18, 0.7853982 }
 0x29c   :  { %v1399_v9 = vadd.s32 %v1398_v45, %v1388_v59  ;;  %vm1474_vm15 = vcmp.gt.s32.totalorder %v1473_v2, 0 }
 0x29d   :  { %v1475_v11 = vsel %vm1474_vm15, %v1473_v2, 0  ;;  %v1378_v15 = vadd.s32 %v1377_v5, %v1368_v23 }
 0x29e   :  { %v1400_v8 = vadd.s32 %v1399_v9, %v1390_v7  ;;  %v1477_v3 = vand.u32 31, %v1475_v11  ;;  %v2093_v6 = vshrl.u32 %v1475_v11, 5 }
 0x29f   :  { %vm1403_vm0 = vc.u32 %v1378_v15, %v1397_v16  ;;  %v1402_v10 = vadd.s32 %v1397_v16, %v1378_v15 }
 0x2a0   :  { %v1404_v19 = vadd.s32 1, %v1400_v8  ;;  %v2095_v20 = vsub.s32 32, %v1477_v3  ;;  %v1480_v36 = vshll.u32 %v1798_v13, %v1477_v3  ;;  %v1483_v27 = vshll.u32 %v1799_v30, %v1477_v3 }
 0x2a1   :  { %v1486_v24 = vshll.u32 %v1800_v34, %v1477_v3  ;;  %v1489_v33 = vshll.u32 %v1801_v37, %v1477_v3  ;;  %v1492_v38 = vshll.u32 %v1802_v40, %v1477_v3  ;;  %vm1495_vm1 = vcmp.lt.s32.totalorder %v2093_v6, 1 }
 0x2a2   :  { %v1405_v1 = vsel %vm1403_vm0, %v1404_v19, %v1400_v8  ;;  %v1481_v26 = vshrl.u32 %v1799_v30, %v2095_v20  ;;  %v1484_v29 = vshrl.u32 %v1800_v34, %v2095_v20  ;;  %v1487_v63 = vshrl.u32 %v1801_v37, %v2095_v20 }
 0x2a3   :  { %v1406_v25 = vadd.s32 %v1405_v1, %v1401_v21  ;;  %v1490_v35 = vshrl.u32 %v1802_v40, %v2095_v20  ;;  %v1493_v39 = vshrl.u32 %v1803_v43, %v2095_v20  ;;  %vm1498_vm2 = vcmp.lt.s32.totalorder %v2093_v6, 4 }
 0x2a4   :  { %v2113_v42 = vor.u32 %v1481_v26, %v1480_v36  ;;  %v2115_v30 = vor.u32 %v1484_v29, %v1483_v27  ;;  %v1488_v60 = vor.u32 %v1487_v63, %v1486_v24  ;;  %v2125_v40 = vshll.u32 %v1471_v22, 8 }
 0x2a5   :  { %v1407_v41 = vadd.s32 536870912, %v1406_v25  ;;  %v1491_v34 = vor.u32 %v1490_v35, %v1489_v33  ;;  %v1494_v44 = vor.u32 %v1493_v39, %v1492_v38  ;;  %vm1497_vm3 = vcmp.lt.s32.totalorder %v2093_v6, 3 }
 0x2a6   :  { %v1503_v37 = vsel %vm1495_vm1, %v2113_v42, %v2115_v30  ;;  %v1507_v47 = vsel %vm1495_vm1, %v2115_v30, %v1488_v60  ;;  %vm1496_vm4 = vcmp.lt.s32.totalorder %v2093_v6, 2  ;;  %v1512_v54 = vand.u32 65535, %v2125_v40 }
 0x2a7   :  { %v2118_v46 = vshrl.u32 %v1407_v41, 30  ;;  %v1504_v43 = vsel %vm1498_vm2, %v1491_v34, 920167782  ;;  %v1508_v17 = vsel %vm1498_vm2, %v1494_v44, 1326507024  ;;  %v1513_v55 = vshrl.u32 %v2125_v40, 16 }
 0x2a8   :  { %v1505_v32 = vsel %vm1497_vm3, %v1488_v60, %v1504_v43  ;;  %v1509_v48 = vsel %vm1497_vm3, %v1491_v34, %v1508_v17  ;;  %v1500_v38 = vsel %vm1498_vm2, %v1488_v60, 2102212464  ;;  %v1479_v43 = vshrl.u32 %v1798_v13, %v2095_v20 }
 0x2a9   :  { %v1409_v56 = vshll.u32 %v2118_v46, 30  ;;  %v1506_v61 = vsel %vm1496_vm4, %v1503_v37, %v1505_v32  ;;  %v1510_v12 = vsel %vm1496_vm4, %v1507_v47, %v1509_v48  ;;  %vm1465_vm0 = vcmp.lt.s32.totalorder %v2075_v31, 0 }
 0x2aa   :  { %v1514_v14 = vand.u32 65535, %v1510_v12  ;;  %v1515_v50 = vshrl.u32 %v1510_v12, 16  ;;  %v1536_v51 = vand.u32 65535, %v1506_v61  ;;  %v1537_v28 = vshrl.u32 %v1506_v61, 16 }
 0x2ab   :  { %v1410_v53 = vsub.s32 %v1406_v25, %v1409_v56  ;;  %v1499_v60 = vsel %vm1495_vm1, %v1479_v43, %v2113_v42  ;;  %vm2185_vm1 = vcmp.le.f32.partialorder %v1463_v62, 0.7853982 }
 0x2ac   :  { %v1517_v59 = vmul.u32 %v1515_v50, %v1512_v54  ;;  %v1518_v45 = vmul.u32 %v1514_v14, %v1513_v55  ;;  %v1539_v23 = vmul.u32 %v1537_v28, %v1512_v54  ;;  %v1516_v7 = vmul.u32 %v1514_v14, %v1512_v54 }
 0x2ad   :  { %vm1411_vm5 = vcmp.lt.s32.totalorder %v1410_v53, 0  ;;  %v1412_v57 = vsub.s32 0, %v1410_v53  ;;  %v1540_v52 = vmul.u32 %v1536_v51, %v1513_v55  ;;  %v1519_v11 = vmul.u32 %v1515_v50, %v1513_v55 }
 0x2ae   :  { %v1520_v9 = vshll.u32 %v1517_v59, 16  ;;  %v1522_v3 = vshll.u32 %v1518_v45, 16  ;;  %v1521_v21 = vshrl.u32 %v1517_v59, 16  ;;  %v1538_v1 = vmul.u32 %v1536_v51, %v1512_v54 }
 0x2af   :  { %v1413_v2 = vsel %vm1411_vm5, %v1412_v57, %v1410_v53  ;;  %v1542_v36 = vshll.u32 %v1539_v23, 16  ;;  %v1544_v24 = vshll.u32 %v1540_v52, 16  ;;  %v1541_v63 = vmul.u32 %v1537_v28, %v1513_v55 }
 0x2b0   :  { %v1414_v5 = vclz %v1413_v2  ;;  %vm1524_vm6 = vc.u32 %v1516_v7, %v1520_v9  ;;  %v1526_v19 = vadd.s32 %v1520_v9, %v1516_v7  ;;  %v1523_v47 = vshrl.u32 %v1518_v45, 16 }
 0x2b1   :  { %v1525_v22 = vsel %vm1524_vm6, 1, %v1793_v0  ;;  %vm1546_vm9 = vc.u32 %v1538_v1, %v1542_v36  ;;  %v1548_v29 = vadd.s32 %v1542_v36, %v1538_v1  ;;  %v1543_v61 = vshrl.u32 %v1539_v23, 16 }
 0x2b2   :  { %v1671_v8 = vadd.s32 4294967294, %v1414_v5  ;;  %v1527_v27 = vadd.s32 %v1525_v22, %v1519_v11  ;;  %vm1528_vm8 = vc.u32 %v1526_v19, %v1522_v3  ;;  %v1547_v39 = vsel %vm1546_vm9, 1, %v1793_v0 }
 0x2b3   :  { %v1529_v26 = vsel %vm1528_vm8, 1, %v1793_v0  ;;  %vm1550_vm10 = vc.u32 %v1548_v29, %v1544_v24  ;;  %v1549_v37 = vadd.s32 %v1547_v39, %v1541_v63  ;;  %v1545_v55 = vshrl.u32 %v1540_v52, 16 }
 0x2b4   :  { %vm1672_vm7 = vcmp.lt.s32.totalorder %v1671_v8, 0  ;;  %v1531_v33 = vadd.s32 %v1529_v26, %v1527_v27  ;;  %v1551_v17 = vsel %vm1550_vm10, 1, %v1793_v0  ;;  %v1552_v13 = vadd.s32 %v1548_v29, %v1544_v24 }
 0x2b5   :  { %v1417_v25 = vsel %vm1672_vm7, 0, %v1671_v8  ;;  %v1553_v48 = vadd.s32 %v1551_v17, %v1549_v37  ;;  %v1432_v27 = vsub.s32 4, %v2118_v46  ;;  %vm1451_vm5 = vweird.f32 %v2025_v4 }
 0x2b6   :  { %v1418_v15 = vsub.s32 32, %v1417_v25  ;;  %v1422_v16 = vsub.s32 4294967266, %v1417_v25  ;;  %v1419_v35 = vshll.u32 %v1410_v53, %v1417_v25  ;;  %v1532_v44 = vadd.s32 %v1531_v33, %v1521_v21 }
 0x2b7   :  { %v1501_v53 = vsel %vm1497_vm3, %v2115_v30, %v1500_v38  ;;  %v1554_v14 = vadd.s32 %v1553_v48, %v1543_v61  ;;  %v1433_v33 = vsel %vm1310_vm12, %v1432_v27, %v2118_v46  ;;  %vm1620_vm6 = vcmask 1043456  }
 0x2b8   :  { %v1420_v41 = vshrl.u32 %v1402_v10, %v1418_v15  ;;  %v1423_v34 = vadd.s32 127, %v1422_v16  ;;  %v1533_v12 = vadd.s32 %v1532_v44, %v1523_v47  ;;  %v1502_v0 = vsel %vm1496_vm4, %v1499_v60, %v1501_v53 }
 0x2b9   :  { %v1555_v51 = vadd.s32 %v1554_v14, %v1545_v55  ;;  %v1556_v42 = vmul.u32 %v2125_v40, %v1502_v0  ;;  %vm1606_vm10 = vweird.f32 %v2075_v31 }
 0x2ba   :  { %v1421_v56 = vor.u32 %v1420_v41, %v1419_v35  ;;  %v1424_v32 = vshll.u32 %v1423_v34, 23  ;;  %vm1558_vm11 = vc.u32 %v1533_v12, %v1552_v13  ;;  %v1557_v26 = vadd.s32 %v1552_v13, %v1533_v12 }
 0x2bb   :  { %v1559_v57 = vadd.s32 1, %v1555_v51  ;;  %v1435_v41 = vsel %vm2167_vm13, 0, %v1433_v33 }
 0x2bc   :  { %v1425_v54 = vor.u32 4788187, %v1424_v32  ;;  %v1428_v50 = vcvt.s32.f32 %v1421_v56  ;;  %v1452_v17 = vadd.s32 3, %v1435_v41  ;;  %v1641_v41 = vlaneseq }
 0x2bd   :  { %v1560_v45 = vsel %vm1558_vm11, %v1559_v57, %v1555_v51  ;;  %vm1638_vm11 = vcmask 1040384  }
 0x2be   :  { %v1426_v20 = vand.u32 2147483647, %v1425_v54  ;;  %v1561_v30 = vadd.s32 %v1560_v45, %v1556_v42  ;;  %v1453_v53 = vand.u32 3, %v1452_v17 }
 0x2c0   :  { %v1429_v28 = vmul.f32 %v1428_v50, %v1426_v20  ;;  %v1562_v5 = vadd.s32 536870912, %v1561_v30  ;;  %vm1455_vm2 = vcmp.eq.s32.totalorder %v1453_v53, 0  ;;  %vm1458_vm3 = vcmp.eq.s32.totalorder %v1453_v53, 2 }
 0x2c1   :  { %vm1454_vm4 = vcmp.lt.s32.totalorder %v1453_v53, 2 }
 0x2c2   :  { %v1430_v59 = vxor.u32 2147483648, %v1429_v28  ;;  %v1563_v7 = vshrl.u32 %v1562_v5, 30 }
 0x2c4   :  { %v1431_v6 = vsel %vm1310_vm12, %v1430_v59, %v1429_v28  ;;  %v1564_v52 = vshll.u32 %v1563_v7, 30  ;;  %v1587_v13 = vsub.s32 4, %v1563_v7  ;;  %vm1643_vm12 = vcmp.lt.s32.totalorder %v1641_v41, 256 }
 0x2c5   :  { %v1434_v23 = vsel %vm2167_vm13, %v2025_v4, %v1431_v6 }
 0x2c6   :  { %v1436_v40 = vmul.f32 %v1434_v23, %v1434_v23  ;;  %v1565_v11 = vsub.s32 %v1561_v30, %v1564_v52  ;;  %v1588_v59 = vsel %vm1465_vm0, %v1587_v13, %v1563_v7 }
 0x2c7   :  { %v1590_v2 = vsel %vm2185_vm1, 0, %v1588_v59 }
 0x2c8   :  { %v1444_v9 = vmul.f32 -0.00019511016, %v1436_v40  ;;  %v1437_v8 = vmul.f32 -0.001358992, %v1436_v40  ;;  %vm1566_vm14 = vcmp.lt.s32.totalorder %v1565_v11, 0  ;;  %v1567_v18 = vsub.s32 0, %v1565_v11 }
 0x2ca   :  { %v1445_v10 = vadd.f32 0.008332121, %v1444_v9  ;;  %v1568_v19 = vsel %vm1566_vm14, %v1567_v18, %v1565_v11  ;;  %v1438_v22 = vadd.f32 0.041655596, %v1437_v8  ;;  %v1607_v9 = vadd.s32 3, %v1590_v2 }
 0x2cb   :  { %v1569_v21 = vclz %v1568_v19 }
 0x2cc   :  { %v1446_v3 = vmul.f32 %v1445_v10, %v1436_v40  ;;  %v1439_v24 = vmul.f32 %v1438_v22, %v1436_v40  ;;  %v1608_v18 = vand.u32 3, %v1607_v9 }
 0x2cd   :  { %v1674_v1 = vadd.s32 4294967294, %v1569_v21 }
 0x2ce   :  { %v1447_v36 = vadd.f32 -0.16666654, %v1446_v3  ;;  %v1440_v35 = vadd.f32 -0.4999988, %v1439_v24  ;;  %vm1610_vm7 = vcmp.eq.s32.totalorder %v1608_v18, 0  ;;  %vm1613_vm8 = vcmp.eq.s32.totalorder %v1608_v18, 2 }
 0x2cf   :  { %vm1675_vm15 = vcmp.lt.s32.totalorder %v1674_v1, 0  ;;  %vm1609_vm9 = vcmp.lt.s32.totalorder %v1608_v18, 2 }
 0x2d0   :  { %v1572_v25 = vsel %vm1675_vm15, 0, %v1674_v1  ;;  %v1448_v15 = vmul.f32 %v1447_v36, %v1436_v40  ;;  %v1441_v43 = vmul.f32 %v1440_v35, %v1436_v40 }
 0x2d1   :  { %v1573_v29 = vsub.s32 32, %v1572_v25  ;;  %v1577_v16 = vsub.s32 4294967266, %v1572_v25  ;;  %v1574_v38 = vshll.u32 %v1565_v11, %v1572_v25 }
 0x2d2   :  { %v1449_v34 = vadd.f32 1.0, %v1448_v15  ;;  %v1442_v48 = vadd.f32 1.0, %v1441_v43 }
 0x2d3   :  { %v1575_v63 = vshrl.u32 %v1557_v26, %v1573_v29  ;;  %v1578_v39 = vadd.s32 127, %v1577_v16 }
 0x2d4   :  { %v1450_v56 = vmul.f32 %v1449_v34, %v1434_v23  ;;  %v1459_v54 = vxor.u32 2147483648, %v1442_v48 }
 0x2d5   :  { %v1576_v44 = vor.u32 %v1575_v63, %v1574_v38  ;;  %v1579_v37 = vshll.u32 %v1578_v39, 23 }
 0x2d6   :  { %v1456_v46 = vxor.u32 2147483648, %v1450_v56  ;;  %v1460_v51 = vsel %vm1458_vm3, %v1459_v54, %v1450_v56 }
 0x2d7   :  { %v1580_v47 = vor.u32 4788187, %v1579_v37  ;;  %v1583_v61 = vcvt.s32.f32 %v1576_v44 }
 0x2d8   :  { %v1457_v50 = vsel %vm1455_vm2, %v1442_v48, %v1456_v46 }
 0x2d9   :  { %v1581_v32 = vand.u32 2147483647, %v1580_v47  ;;  %v1461_v42 = vsel %vm1454_vm4, %v1457_v50, %v1460_v51 }
 0x2da   :  { %v1462_v30 = vsel %vm1451_vm5, nan, %v1461_v42 }
 0x2db   :  { %v1584_v60 = vmul.f32 %v1583_v61, %v1581_v32  ;;  %v1618_v52 = vmul.f32 %v1462_v30, %v1863_v49 }
 0x2dd   :  { %v1585_v12 = vxor.u32 2147483648, %v1584_v60  ;;  %v1621_v3 = vsel %vm1620_vm6, %v1618_v52, 0.0 }
 0x2de   :  { %v1622_v22 = vrot.slane %v1621_v3, 4 }
 0x2df   :  { %v1586_v14 = vsel %vm1465_vm0, %v1585_v12, %v1584_v60 }
 0x2e0   :  { %v1589_v20 = vsel %vm2185_vm1, %v2075_v31, %v1586_v14  ;;  %v1623_v24 = vadd.f32 %v1622_v22, %v1621_v3 }
 0x2e1   :  { %v1591_v0 = vmul.f32 %v1589_v20, %v1589_v20 }
 0x2e2   :  { %v1624_v29 = vrot.slane %v1623_v24, 2 }
 0x2e3   :  { %v1592_v28 = vmul.f32 -0.001358992, %v1591_v0  ;;  %v1599_v57 = vmul.f32 -0.00019511016, %v1591_v0 }
 0x2e4   :  { %v1625_v33 = vadd.f32 %v1624_v29, %v1623_v24 }
 0x2e5   :  { %v1593_v62 = vadd.f32 0.041655596, %v1592_v28  ;;  %v1600_v45 = vadd.f32 0.008332121, %v1599_v57 }
 0x2e6   :  { %v1626_v38 = vrot.slane %v1625_v33, 1 }
 0x2e7   :  { %v1594_v6 = vmul.f32 %v1593_v62, %v1591_v0  ;;  %v1601_v23 = vmul.f32 %v1600_v45, %v1591_v0 }
 0x2e9   :  { %v1595_v5 = vadd.f32 -0.4999988, %v1594_v6  ;;  %v1602_v40 = vadd.f32 -0.16666654, %v1601_v23 }
 0x2eb   :  { %v1596_v10 = vmul.f32 %v1595_v5, %v1591_v0  ;;  %v1603_v11 = vmul.f32 %v1602_v40, %v1591_v0 }
 0x2ed   :  { %v1597_v8 = vadd.f32 1.0, %v1596_v10  ;;  %v1604_v7 = vadd.f32 1.0, %v1603_v11 }
 0x2ef   :  { %v1605_v4 = vmul.f32 %v1604_v7, %v1589_v20  ;;  %v1614_v19 = vxor.u32 2147483648, %v1597_v8 }
 0x2f1   :  { %v1611_v21 = vxor.u32 2147483648, %v1605_v4  ;;  %v1615_v36 = vsel %vm1613_vm8, %v1614_v19, %v1605_v4 }
 0x2f3   :  { %v1612_v1 = vsel %vm1610_vm7, %v1597_v8, %v1611_v21 }
 0x2f4   :  { %v1616_v49 = vsel %vm1609_vm9, %v1612_v1, %v1615_v36 }
 0x2f5   :  { %v1617_v27 = vsel %vm1606_vm10, nan, %v1616_v49 }
 0x2f6   :  { %v1619_v25 = vmul.f32 %v1617_v27, %v1865_v58  ;;  %v1627_v58 = vadd.f32 %v1626_v38, %v1625_v33 }
 0x2f8   :  { %v1628_v26 = vsel %vm1620_vm6, %v1619_v25, 0.0 }
 0x2f9   :  { %v1629_v15 = vrot.slane %v1628_v26, 4 }
 0x2fb   :  { %v1630_v16 = vadd.f32 %v1629_v15, %v1628_v26 }
 0x2fd   :  { %v1631_v63 = vrot.slane %v1630_v16, 2 }
 0x2ff   :  { %v1632_v35 = vadd.f32 %v1631_v63, %v1630_v16 }
 0x301   :  { %v1633_v39 = vrot.slane %v1632_v35, 1 }
 0x303   :  { %v1634_v34 = vadd.f32 %v1633_v39, %v1632_v35 }
 0x305   :  { %v1637_v31 = vrot.slane %v1634_v34, 7 }
 0x307   :  { %v1639_v44 = vsel %vm1638_vm11, %v1627_v58, %v1637_v31 }
 0x308   :  { %1645 = vst.msk [vmem:[#allocation7] sm:$0x3] %vm1643_vm12, %v1639_v44 }
 0x309   :  { %1656 = dma.vmem_to_hbm [thread:$0]  %s1652_s1, 32, %s1654_s23, [#allocation4]  }
 0x30a   :  { %1787 = dma.done.wait [#allocation4], 32  }
 0x30b   :  { %1788 = vsyncadd [#allocation4], 4294967264 }
 0x30c   :  { %1661 = vsyncpa [#allocation3], 1 }
 0x30d   :  { %1662 = vsyncpa [#allocation6], 1 }
 0x30e   :  { %1663 = vsyncpa [#allocation4], 1 }

</bundles_post_ra>
